<compile_context>
chip_gen: v7x
topology: tpu7x:2x2x1
jax: 0.10.0
libtpu: 0.0.40
codegen_flags: <defaults>
</compile_context>

<pallas_src>
import functools

import jax
import jax.numpy as jnp
from jax import lax
from jax.experimental import pallas as pl
from jax.experimental.pallas import tpu as pltpu

_LANE = 128
_VMEM_LIMIT = 48 * 1024 * 1024   # safely under v7x's 64 MiB physical VMEM
_CHANNELS = (64, 128, 256, 512)
_STRIDES = (1, 2, 2, 2)


def _ru(x, m=_LANE):
    return ((x + m - 1) // m) * m


# ----------------------------- Pallas kernels ------------------------------ #

def _conv3x3_flat_acc(ph_ref, w_ref, stride, seg, wq, rows):
    """Accumulate the 9 taps of a 3x3/pad-1 conv as MXU matmuls (f32 acc).

    ph_ref : (stride*stride*seg, Cin) bf16 -- phase-decomposed, zero-padded,
             row-major flattened input (see `_conv_input_flat`).
    w_ref  : (9, Cin, Cout) bf16.
    Valid outputs live at flat rows h*wq + w with w < wo; the extra "junk"
    columns are masked / discarded by the caller.
    """
    cout = w_ref.shape[-1]
    acc = jnp.zeros((rows, cout), jnp.float32)
    for kh in range(3):
        for kw in range(3):
            p = (kh % stride) * stride + (kw % stride)
            r0 = p * seg + (kh // stride) * wq + (kw // stride)
            acc = acc + jnp.dot(ph_ref[r0:r0 + rows, :], w_ref[kh * 3 + kw],
                                preferred_element_type=jnp.float32)
    return acc


def _conv_bn_relu_kernel(ph_ref, w_ref, s_ref, b_ref, o_ref, *,
                         stride, seg, wq, rows):
    acc = _conv3x3_flat_acc(ph_ref, w_ref, stride, seg, wq, rows)
    o_ref[...] = jnp.maximum(acc * s_ref[...] + b_ref[...], 0.0).astype(o_ref.dtype)


def _res_block_kernel(ph_ref, mask_ref, w1_ref, s1_ref, b1_ref,
                      w2_ref, s2_ref, b2_ref, *rest,
                      stride, seg, wq, rows, has_proj):
    """Fused ResidualBlock: conv1+bn1+relu -> conv2+bn2 -> (+shortcut) -> relu.

    conv1's output never leaves VMEM: it is written (zero-padded) into a VMEM
    scratch whose rows conv2's taps read directly.
    """
    if has_proj:
        xs_ref, wsc_ref, ssc_ref, bsc_ref, o_ref, h1p_ref = rest
    else:
        o_ref, h1p_ref = rest

    # conv1 + bn1 + relu.  Junk columns (w >= wo) are zeroed by the mask so
    # that, after the shifted store below, they become conv2's zero padding.
    acc1 = _conv3x3_flat_acc(ph_ref, w1_ref, stride, seg, wq, rows)
    h1 = jnp.maximum(acc1 * s1_ref[...] + b1_ref[...], 0.0) * mask_ref[...]

    # Lay h1 out as a zero-padded stride-1 conv input inside VMEM.
    h1p_ref[...] = jnp.zeros(h1p_ref.shape, h1p_ref.dtype)
    h1p_ref[wq + 1:wq + 1 + rows, :] = h1.astype(h1p_ref.dtype)

    # conv2 + bn2 (3x3, stride 1, pad 1) read straight from the scratch.
    cp = w2_ref.shape[-1]
    acc2 = jnp.zeros((rows, cp), jnp.float32)
    for kh in range(3):
        for kw in range(3):
            r0 = kh * wq + kw
            acc2 = acc2 + jnp.dot(h1p_ref[r0:r0 + rows, :], w2_ref[kh * 3 + kw],
                                  preferred_element_type=jnp.float32)
    y = acc2 * s2_ref[...] + b2_ref[...]

    if has_proj:
        # 1x1 projection shortcut (matmul + folded BN), fused in-kernel.
        sc = jnp.dot(xs_ref[...], wsc_ref[...], preferred_element_type=jnp.float32)
        sc = sc * ssc_ref[...] + bsc_ref[...]
    else:
        # Identity shortcut: plain elementwise add, no matmul.  The residual
        # is a shifted slice of the (stride-1) phase-flat input already in VMEM.
        sc = ph_ref[wq + 1:wq + 1 + rows, :].astype(jnp.float32)

    o_ref[...] = jnp.maximum(y + sc, 0.0).astype(o_ref.dtype)


def _avgpool_fc_kernel(f_ref, w_ref, b_ref, o_ref):
    f = f_ref[...].astype(jnp.float32)
    pooled = jnp.mean(f, axis=1)                       # global average pool
    o_ref[...] = jnp.dot(pooled, w_ref[...],
                         preferred_element_type=jnp.float32) + b_ref[...]


# ------------------------------- JAX glue ---------------------------------- #

def _conv_input_flat(x, stride):
    """Phase-decompose + zero-pad + flatten the NHWC input for a 3x3/pad-1 conv.

    Returns (ph_flat, seg, wq, ho, wo):
      ph_flat : (N, stride*stride*seg, C) bf16 -- per-phase row-major images,
                each with pitch wq = wo + 2, plus a small zero tail so every
                in-kernel tap slice stays in bounds.
    No 9x patch inflation: total size ~= padded input size.
    """
    n, h, w, c = x.shape
    if stride == 2:
        assert h % 2 == 0 and w % 2 == 0
    ho = (h + 2 - 3) // stride + 1
    wo = (w + 2 - 3) // stride + 1
    xp = jnp.pad(x, ((0, 0), (1, 1), (1, 1), (0, 0)))
    phases = [xp[:, i::stride, j::stride, :]
              for i in range(stride) for j in range(stride)]
    ph = jnp.stack(phases, axis=1)                     # (N, P, Hq, Wq, C)
    hq, wq_nat = ph.shape[2], ph.shape[3]
    wq = wo + 2                                        # unified output pitch
    if wq > wq_nat:
        ph = jnp.pad(ph, ((0, 0), (0, 0), (0, 0), (0, wq - wq_nat), (0, 0)))
    tail = 3 - stride
    ph = ph.reshape(n, stride * stride, hq * wq, c)
    ph = jnp.pad(ph, ((0, 0), (0, 0), (0, tail), (0, 0)))
    seg = hq * wq + tail
    return ph.reshape(n, stride * stride * seg, c), seg, wq, ho, wo


def conv3x3_bn_relu(x, w9, scale, bias, stride):
    """Standalone fused 3x3 conv + folded BN + ReLU (used for the stem)."""
    n, _, _, cin_p = x.shape
    cout_p = w9.shape[-1]
    ph, seg, wq, ho, wo = _conv_input_flat(x, stride)
    rows = ho * wq
    kern = functools.partial(_conv_bn_relu_kernel,
                             stride=stride, seg=seg, wq=wq, rows=rows)
    flops = 2 * n * rows * (9 * cin_p) * cout_p
    bytes_accessed = (int(ph.size) * 2 + int(w9.size) * 2 +
                      int(scale.size + bias.size) * 4 + n * rows * cout_p * 2)
    out = pl.pallas_call(
        kern,
        out_shape=jax.ShapeDtypeStruct((n, rows, cout_p), jnp.bfloat16),
        grid_spec=pltpu.PrefetchScalarGridSpec(
            num_scalar_prefetch=0,
            grid=(n,),
            in_specs=[
                pl.BlockSpec((None, ph.shape[1], cin_p), lambda i: (i, 0, 0)),
                pl.BlockSpec(w9.shape, lambda i: (0, 0, 0)),
                pl.BlockSpec(scale.shape, lambda i: (0, 0)),
                pl.BlockSpec(bias.shape, lambda i: (0, 0)),
            ],
            out_specs=pl.BlockSpec((None, rows, cout_p), lambda i: (i, 0, 0)),
        ),
        compiler_params=pltpu.CompilerParams(
            dimension_semantics=("parallel",),
            vmem_limit_bytes=_VMEM_LIMIT),
        cost_estimate=pl.CostEstimate(flops=flops, transcendentals=0,
                                      bytes_accessed=bytes_accessed),
    )(ph, w9, scale, bias)
    return out.reshape(n, ho, wq, cout_p)[:, :, :wo, :]


def residual_block(x, blk):
    """One fused ResidualBlock (single pallas_call)."""
    stride = blk['stride']
    n, _, _, cin_p = x.shape
    cout_p = blk['w1'].shape[-1]
    ph, seg, wq, ho, wo = _conv_input_flat(x, stride)
    rows = ho * wq
    mask = (jnp.arange(rows) % wq < wo).astype(jnp.float32).reshape(rows, 1)
    has_proj = 'wsc' in blk

    kern = functools.partial(_res_block_kernel, stride=stride, seg=seg,
                             wq=wq, rows=rows, has_proj=has_proj)
    inputs = [ph, mask, blk['w1'], blk['s1'], blk['b1'],
              blk['w2'], blk['s2'], blk['b2']]
    in_specs = [
        pl.BlockSpec((None, ph.shape[1], cin_p), lambda i: (i, 0, 0)),
        pl.BlockSpec(mask.shape, lambda i: (0, 0)),
        pl.BlockSpec(blk['w1'].shape, lambda i: (0, 0, 0)),
        pl.BlockSpec(blk['s1'].shape, lambda i: (0, 0)),
        pl.BlockSpec(blk['b1'].shape, lambda i: (0, 0)),
        pl.BlockSpec(blk['w2'].shape, lambda i: (0, 0, 0)),
        pl.BlockSpec(blk['s2'].shape, lambda i: (0, 0)),
        pl.BlockSpec(blk['b2'].shape, lambda i: (0, 0)),
    ]
    if has_proj:
        xs = x[:, ::stride, ::stride, :]
        xs = jnp.pad(xs, ((0, 0), (0, 0), (0, wq - wo), (0, 0)))
        xs = xs.reshape(n, rows, cin_p)
        inputs += [xs, blk['wsc'], blk['ssc'], blk['bsc']]
        in_specs += [
            pl.BlockSpec((None, rows, cin_p), lambda i: (i, 0, 0)),
            pl.BlockSpec(blk['wsc'].shape, lambda i: (0, 0)),
            pl.BlockSpec(blk['ssc'].shape, lambda i: (0, 0)),
            pl.BlockSpec(blk['bsc'].shape, lambda i: (0, 0)),
        ]

    flops = 2 * n * rows * cout_p * (
        9 * cin_p + 9 * cout_p + (cin_p if has_proj else 0))
    bytes_accessed = (sum(int(a.size) * a.dtype.itemsize for a in inputs)
                      + n * rows * cout_p * 2)
    out = pl.pallas_call(
        kern,
        out_shape=jax.ShapeDtypeStruct((n, rows, cout_p), jnp.bfloat16),
        grid_spec=pltpu.PrefetchScalarGridSpec(
            num_scalar_prefetch=0,
            grid=(n,),
            in_specs=in_specs,
            out_specs=pl.BlockSpec((None, rows, cout_p), lambda i: (i, 0, 0)),
            scratch_shapes=[pltpu.VMEM((rows + 2 * wq + 2, cout_p), jnp.bfloat16)],
        ),
        compiler_params=pltpu.CompilerParams(
            dimension_semantics=("parallel",),
            vmem_limit_bytes=_VMEM_LIMIT),
        cost_estimate=pl.CostEstimate(flops=flops, transcendentals=0,
                                      bytes_accessed=bytes_accessed),
    )(*inputs)
    return out.reshape(n, ho, wq, cout_p)[:, :, :wo, :]


def avgpool_fc(feats, w_fc, b_fc):
    n, hh, ww, cp = feats.shape
    f = feats.reshape(n, hh * ww, cp)
    nc_p = w_fc.shape[-1]
    return pl.pallas_call(
        _avgpool_fc_kernel,
        out_shape=jax.ShapeDtypeStruct((n, nc_p), jnp.float32),
        grid_spec=pltpu.PrefetchScalarGridSpec(
            num_scalar_prefetch=0,
            grid=(1,),
            in_specs=[
                pl.BlockSpec(f.shape, lambda i: (0, 0, 0)),
                pl.BlockSpec(w_fc.shape, lambda i: (0, 0)),
                pl.BlockSpec(b_fc.shape, lambda i: (0, 0)),
            ],
            out_specs=pl.BlockSpec((n, nc_p), lambda i: (0, 0)),
        ),
        compiler_params=pltpu.CompilerParams(dimension_semantics=("arbitrary",)),
    )(f, w_fc, b_fc)


# ---------------------- parameters: init & kernel prep ---------------------- #

def _init_conv(key, cout, cin, ksize=3):
    std = (2.0 / (cin * ksize * ksize)) ** 0.5
    return std * jax.random.normal(key, (cout, cin, ksize, ksize), dtype=jnp.float32)


def _init_bn(key, c):
    k1, k2, k3, k4 = jax.random.split(key, 4)
    gamma = jax.random.uniform(k1, (c,), minval=0.5, maxval=1.5)
    beta = 0.1 * jax.random.normal(k2, (c,))
    mean = 0.1 * jax.random.normal(k3, (c,))
    var = jax.random.uniform(k4, (c,), minval=0.5, maxval=1.5)
    return gamma, beta, mean, var


def init_resnet_params(key, num_blocks=(1, 1, 1, 1), num_classes=10):
    params = {}
    key, k1, k2 = jax.random.split(key, 3)
    params['stem_w'] = _init_conv(k1, 64, 3)
    params['stem_bn'] = _init_bn(k2, 64)
    layers = []
    in_ch = 64
    for out_ch, nb, s0 in zip(_CHANNELS, num_blocks, _STRIDES):
        blocks = []
        for bi in range(nb):
            stride = s0 if bi == 0 else 1
            key, k1, k2, k3, k4 = jax.random.split(key, 5)
            blk = {'stride': stride,
                   'w1': _init_conv(k1, out_ch, in_ch), 'bn1': _init_bn(k2, out_ch),
                   'w2': _init_conv(k3, out_ch, out_ch), 'bn2': _init_bn(k4, out_ch)}
            if stride != 1 or in_ch != out_ch:
                key, k5, k6 = jax.random.split(key, 3)
                blk['wsc'] = _init_conv(k5, out_ch, in_ch, ksize=1)
                blk['bnsc'] = _init_bn(k6, out_ch)
            blocks.append(blk)
            in_ch = out_ch
        layers.append(blocks)
    params['layers'] = layers
    key, k1, k2 = jax.random.split(key, 3)
    params['fc_w'] = (1.0 / (512 ** 0.5)) * jax.random.normal(k1, (num_classes, 512))
    params['fc_b'] = 0.01 * jax.random.normal(k2, (num_classes,))
    return params


def _prep_conv3(w, cin_p, cout_p):
    co, ci, kh, kw = w.shape
    wt = jnp.transpose(w, (2, 3, 1, 0)).reshape(kh * kw, ci, co)
    wt = jnp.pad(wt, ((0, 0), (0, cin_p - ci), (0, cout_p - co)))
    return wt.astype(jnp.bfloat16)


def _prep_conv1x1(w, cin_p, cout_p):
    co, ci, _, _ = w.shape
    wt = jnp.transpose(w, (2, 3, 1, 0)).reshape(ci, co)
    wt = jnp.pad(wt, ((0, cin_p - ci), (0, cout_p - co)))
    return wt.astype(jnp.bfloat16)


def _prep_bn(bn, cout_p, eps=1e-5):
    gamma, beta, mean, var = bn
    scale = gamma / jnp.sqrt(var + eps)
    bias = beta - mean * scale
    scale = jnp.pad(scale, (0, cout_p - scale.shape[0])).reshape(1, -1).astype(jnp.float32)
    bias = jnp.pad(bias, (0, cout_p - bias.shape[0])).reshape(1, -1).astype(jnp.float32)
    return scale, bias


def prep_params(raw, num_classes=10):
    prep = {'num_classes': num_classes, 'stem_cin_p': 8}
    stem_cout_p = _ru(64)
    s, b = _prep_bn(raw['stem_bn'], stem_cout_p)
    prep['stem'] = {'w': _prep_conv3(raw['stem_w'], prep['stem_cin_p'], stem_cout_p),
                    's': s, 'b': b}
    layers = []
    in_p = stem_cout_p
    for blocks in raw['layers']:
        pblocks = []
        for blk in blocks:
            out_p = _ru(blk['w1'].shape[0])
            pb = {'stride': blk['stride'],
                  'w1': _prep_conv3(blk['w1'], in_p, out_p),
                  'w2': _prep_conv3(blk['w2'], out_p, out_p)}
            pb['s1'], pb['b1'] = _prep_bn(blk['bn1'], out_p)
            pb['s2'], pb['b2'] = _prep_bn(blk['bn2'], out_p)
            if 'wsc' in blk:
                pb['wsc'] = _prep_conv1x1(blk['wsc'], in_p, out_p)
                pb['ssc'], pb['bsc'] = _prep_bn(blk['bnsc'], out_p)
            pblocks.append(pb)
            in_p = out_p
        layers.append(pblocks)
    prep['layers'] = layers
    fcw = jnp.transpose(raw['fc_w'], (1, 0))                      # (512, nc)
    nc_p = _ru(num_classes)
    prep['fc_w'] = jnp.pad(fcw, ((0, 0), (0, nc_p - num_classes))).astype(jnp.float32)
    prep['fc_b'] = jnp.pad(raw['fc_b'], (0, nc_p - num_classes)).reshape(1, -1).astype(jnp.float32)
    return prep


# -------------------------------- forward ----------------------------------- #

def resnet_forward(x_nchw, prep):
    x = jnp.transpose(x_nchw, (0, 2, 3, 1))                       # NHWC
    x = jnp.pad(x, ((0, 0), (0, 0), (0, 0), (0, prep['stem_cin_p'] - x.shape[3])))
    x = x.astype(jnp.bfloat16)
    h = conv3x3_bn_relu(x, prep['stem']['w'], prep['stem']['s'],
                        prep['stem']['b'], stride=1)
    for blocks in prep['layers']:
        for blk in blocks:
            h = residual_block(h, blk)
    logits = avgpool_fc(h, prep['fc_w'], prep['fc_b'])
    return logits[:, :prep['num_classes']]


# ----------------------------- pure-JAX reference --------------------------- #

def reference_forward(x, raw, eps=1e-5):
    def conv(x, w, s, pad):
        return lax.conv_general_dilated(
            x, w, (s, s), [(pad, pad), (pad, pad)],
            dimension_numbers=("NCHW", "OIHW", "NCHW"))

    def bn(x, p):
        gamma, beta, mean, var = p
        inv = gamma / jnp.sqrt(var + eps)
        return x * inv[None, :, None, None] + (beta - mean * inv)[None, :, None, None]

    out = jax.nn.relu(bn(conv(x, raw['stem_w'], 1, 1), raw['stem_bn']))
    for blocks in raw['layers']:
        for blk in blocks:
            s = blk['stride']
            h = jax.nn.relu(bn(conv(out, blk['w1'], s, 1), blk['bn1']))
            h = bn(conv(h, blk['w2'], 1, 1), blk['bn2'])
            sc = bn(conv(out, blk['wsc'], s, 0), blk['bnsc']) if 'wsc' in blk else out
            out = jax.nn.relu(h + sc)
    pooled = out.mean(axis=(2, 3))
    return pooled @ raw['fc_w'].T + raw['fc_b']


# ---------------------------------- main ------------------------------------ #

if __name__ == "__main__":
    key = jax.random.PRNGKey(0)
    kx, kp = jax.random.split(key)
    x = jax.random.normal(kx, (2, 3, 16, 16), dtype=jnp.float32)
    raw = init_resnet_params(kp, num_blocks=(1, 1, 1, 1), num_classes=10)
    prep = prep_params(raw, num_classes=10)

    out = jax.block_until_ready(resnet_forward(x, prep))
    ref = reference_forward(x, raw)

    assert out.shape == ref.shape == (2, 10)
    assert bool(jnp.all(jnp.isfinite(out)))
    # bf16 MXU operands (f32 accumulation) -> relaxed tolerance vs f32 reference.
    rel = float(jnp.linalg.norm(out - ref) / (jnp.linalg.norm(ref) + 1e-6))
    if rel > 0.1:
        raise SystemExit(f"mismatch: relative L2 error {rel:.4f}")
    print("KERNEL_OK")
</pallas_src>

<mosaic_0001>
module attributes {stable_mosaic.version = 11 : i64} {
  func.func @_conv_bn_relu_kernel(%arg0: i32, %arg1: memref<1x326x8xbf16, #tpu.memory_space<vmem>>, %arg2: memref<9x8x128xbf16, #tpu.memory_space<vmem>>, %arg3: memref<1x128xf32, #tpu.memory_space<vmem>>, %arg4: memref<1x128xf32, #tpu.memory_space<vmem>>, %arg5: memref<1x288x128xbf16, #tpu.memory_space<vmem>>) attributes {dimension_semantics = [#tpu.dimension_semantics<parallel>], iteration_bounds = array<i64: 2>, scalar_prefetch = 0 : i64, scratch_operands = 0 : i64, tpu.core_type = #tpu.core_type<tc>, window_params = [{transform_indices = @transform_0, window_bounds = array<i64: 1, 326, 8>}, {pipeline_mode = #tpu.pipeline_mode<synchronous>, transform_indices = @transform_1, window_bounds = array<i64: 9, 8, 128>}, {pipeline_mode = #tpu.pipeline_mode<synchronous>, transform_indices = @transform_2, window_bounds = array<i64: 1, 128>}, {pipeline_mode = #tpu.pipeline_mode<synchronous>, transform_indices = @transform_3, window_bounds = array<i64: 1, 128>}, {transform_indices = @transform_4, window_bounds = array<i64: 1, 288, 128>}]} {
    %cst = arith.constant 0.000000e+00 : f32
    %0 = vector.broadcast %cst : f32 to vector<288x128xf32>
    %c0 = arith.constant 0 : index
    %c0_0 = arith.constant 0 : index
    %c0_1 = arith.constant 0 : index
    %1 = vector.load %arg1[%c0, %c0_0, %c0_1] : memref<1x326x8xbf16, #tpu.memory_space<vmem>>, vector<1x288x8xbf16>
    %2 = vector.shape_cast %1 : vector<1x288x8xbf16> to vector<288x8xbf16>
    %c0_2 = arith.constant 0 : index
    %c0_3 = arith.constant 0 : index
    %c0_4 = arith.constant 0 : index
    %3 = vector.load %arg2[%c0_2, %c0_3, %c0_4] : memref<9x8x128xbf16, #tpu.memory_space<vmem>>, vector<1x8x128xbf16>
    %4 = vector.shape_cast %3 : vector<1x8x128xbf16> to vector<8x128xbf16>
    %cst_5 = arith.constant dense<0.000000e+00> : vector<288x128xf32>
    %5 = tpu.matmul %2, %4, %cst_5 {dimension_numbers = #tpu.dot_dimension_numbers<[1], [0], [0], [1], [0, 0, 1, 1], [], []>} : vector<288x8xbf16>, vector<8x128xbf16>, vector<288x128xf32> -> vector<288x128xf32>
    %6 = arith.addf %0, %5 : vector<288x128xf32>
    %c0_6 = arith.constant 0 : index
    %c1 = arith.constant 1 : index
    %c0_7 = arith.constant 0 : index
    %7 = vector.load %arg1[%c0_6, %c1, %c0_7] : memref<1x326x8xbf16, #tpu.memory_space<vmem>>, vector<1x288x8xbf16>
    %8 = vector.shape_cast %7 : vector<1x288x8xbf16> to vector<288x8xbf16>
    %c1_8 = arith.constant 1 : index
    %c0_9 = arith.constant 0 : index
    %c0_10 = arith.constant 0 : index
    %9 = vector.load %arg2[%c1_8, %c0_9, %c0_10] : memref<9x8x128xbf16, #tpu.memory_space<vmem>>, vector<1x8x128xbf16>
    %10 = vector.shape_cast %9 : vector<1x8x128xbf16> to vector<8x128xbf16>
    %cst_11 = arith.constant dense<0.000000e+00> : vector<288x128xf32>
    %11 = tpu.matmul %8, %10, %cst_11 {dimension_numbers = #tpu.dot_dimension_numbers<[1], [0], [0], [1], [0, 0, 1, 1], [], []>} : vector<288x8xbf16>, vector<8x128xbf16>, vector<288x128xf32> -> vector<288x128xf32>
    %12 = arith.addf %6, %11 : vector<288x128xf32>
    %c0_12 = arith.constant 0 : index
    %c2 = arith.constant 2 : index
    %c0_13 = arith.constant 0 : index
    %13 = vector.load %arg1[%c0_12, %c2, %c0_13] : memref<1x326x8xbf16, #tpu.memory_space<vmem>>, vector<1x288x8xbf16>
    %14 = vector.shape_cast %13 : vector<1x288x8xbf16> to vector<288x8xbf16>
    %c2_14 = arith.constant 2 : index
    %c0_15 = arith.constant 0 : index
    %c0_16 = arith.constant 0 : index
    %15 = vector.load %arg2[%c2_14, %c0_15, %c0_16] : memref<9x8x128xbf16, #tpu.memory_space<vmem>>, vector<1x8x128xbf16>
    %16 = vector.shape_cast %15 : vector<1x8x128xbf16> to vector<8x128xbf16>
    %cst_17 = arith.constant dense<0.000000e+00> : vector<288x128xf32>
    %17 = tpu.matmul %14, %16, %cst_17 {dimension_numbers = #tpu.dot_dimension_numbers<[1], [0], [0], [1], [0, 0, 1, 1], [], []>} : vector<288x8xbf16>, vector<8x128xbf16>, vector<288x128xf32> -> vector<288x128xf32>
    %18 = arith.addf %12, %17 : vector<288x128xf32>
    %c0_18 = arith.constant 0 : index
    %c18 = arith.constant 18 : index
    %c0_19 = arith.constant 0 : index
    %19 = vector.load %arg1[%c0_18, %c18, %c0_19] : memref<1x326x8xbf16, #tpu.memory_space<vmem>>, vector<1x288x8xbf16>
    %20 = vector.shape_cast %19 : vector<1x288x8xbf16> to vector<288x8xbf16>
    %c3 = arith.constant 3 : index
    %c0_20 = arith.constant 0 : index
    %c0_21 = arith.constant 0 : index
    %21 = vector.load %arg2[%c3, %c0_20, %c0_21] : memref<9x8x128xbf16, #tpu.memory_space<vmem>>, vector<1x8x128xbf16>
    %22 = vector.shape_cast %21 : vector<1x8x128xbf16> to vector<8x128xbf16>
    %cst_22 = arith.constant dense<0.000000e+00> : vector<288x128xf32>
    %23 = tpu.matmul %20, %22, %cst_22 {dimension_numbers = #tpu.dot_dimension_numbers<[1], [0], [0], [1], [0, 0, 1, 1], [], []>} : vector<288x8xbf16>, vector<8x128xbf16>, vector<288x128xf32> -> vector<288x128xf32>
    %24 = arith.addf %18, %23 : vector<288x128xf32>
    %c0_23 = arith.constant 0 : index
    %c19 = arith.constant 19 : index
    %c0_24 = arith.constant 0 : index
    %25 = vector.load %arg1[%c0_23, %c19, %c0_24] : memref<1x326x8xbf16, #tpu.memory_space<vmem>>, vector<1x288x8xbf16>
    %26 = vector.shape_cast %25 : vector<1x288x8xbf16> to vector<288x8xbf16>
    %c4 = arith.constant 4 : index
    %c0_25 = arith.constant 0 : index
    %c0_26 = arith.constant 0 : index
    %27 = vector.load %arg2[%c4, %c0_25, %c0_26] : memref<9x8x128xbf16, #tpu.memory_space<vmem>>, vector<1x8x128xbf16>
    %28 = vector.shape_cast %27 : vector<1x8x128xbf16> to vector<8x128xbf16>
    %cst_27 = arith.constant dense<0.000000e+00> : vector<288x128xf32>
    %29 = tpu.matmul %26, %28, %cst_27 {dimension_numbers = #tpu.dot_dimension_numbers<[1], [0], [0], [1], [0, 0, 1, 1], [], []>} : vector<288x8xbf16>, vector<8x128xbf16>, vector<288x128xf32> -> vector<288x128xf32>
    %30 = arith.addf %24, %29 : vector<288x128xf32>
    %c0_28 = arith.constant 0 : index
    %c20 = arith.constant 20 : index
    %c0_29 = arith.constant 0 : index
    %31 = vector.load %arg1[%c0_28, %c20, %c0_29] : memref<1x326x8xbf16, #tpu.memory_space<vmem>>, vector<1x288x8xbf16>
    %32 = vector.shape_cast %31 : vector<1x288x8xbf16> to vector<288x8xbf16>
    %c5 = arith.constant 5 : index
    %c0_30 = arith.constant 0 : index
    %c0_31 = arith.constant 0 : index
    %33 = vector.load %arg2[%c5, %c0_30, %c0_31] : memref<9x8x128xbf16, #tpu.memory_space<vmem>>, vector<1x8x128xbf16>
    %34 = vector.shape_cast %33 : vector<1x8x128xbf16> to vector<8x128xbf16>
    %cst_32 = arith.constant dense<0.000000e+00> : vector<288x128xf32>
    %35 = tpu.matmul %32, %34, %cst_32 {dimension_numbers = #tpu.dot_dimension_numbers<[1], [0], [0], [1], [0, 0, 1, 1], [], []>} : vector<288x8xbf16>, vector<8x128xbf16>, vector<288x128xf32> -> vector<288x128xf32>
    %36 = arith.addf %30, %35 : vector<288x128xf32>
    %c0_33 = arith.constant 0 : index
    %c36 = arith.constant 36 : index
    %c0_34 = arith.constant 0 : index
    %37 = vector.load %arg1[%c0_33, %c36, %c0_34] : memref<1x326x8xbf16, #tpu.memory_space<vmem>>, vector<1x288x8xbf16>
    %38 = vector.shape_cast %37 : vector<1x288x8xbf16> to vector<288x8xbf16>
    %c6 = arith.constant 6 : index
    %c0_35 = arith.constant 0 : index
    %c0_36 = arith.constant 0 : index
    %39 = vector.load %arg2[%c6, %c0_35, %c0_36] : memref<9x8x128xbf16, #tpu.memory_space<vmem>>, vector<1x8x128xbf16>
    %40 = vector.shape_cast %39 : vector<1x8x128xbf16> to vector<8x128xbf16>
    %cst_37 = arith.constant dense<0.000000e+00> : vector<288x128xf32>
    %41 = tpu.matmul %38, %40, %cst_37 {dimension_numbers = #tpu.dot_dimension_numbers<[1], [0], [0], [1], [0, 0, 1, 1], [], []>} : vector<288x8xbf16>, vector<8x128xbf16>, vector<288x128xf32> -> vector<288x128xf32>
    %42 = arith.addf %36, %41 : vector<288x128xf32>
    %c0_38 = arith.constant 0 : index
    %c37 = arith.constant 37 : index
    %c0_39 = arith.constant 0 : index
    %43 = vector.load %arg1[%c0_38, %c37, %c0_39] : memref<1x326x8xbf16, #tpu.memory_space<vmem>>, vector<1x288x8xbf16>
    %44 = vector.shape_cast %43 : vector<1x288x8xbf16> to vector<288x8xbf16>
    %c7 = arith.constant 7 : index
    %c0_40 = arith.constant 0 : index
    %c0_41 = arith.constant 0 : index
    %45 = vector.load %arg2[%c7, %c0_40, %c0_41] : memref<9x8x128xbf16, #tpu.memory_space<vmem>>, vector<1x8x128xbf16>
    %46 = vector.shape_cast %45 : vector<1x8x128xbf16> to vector<8x128xbf16>
    %cst_42 = arith.constant dense<0.000000e+00> : vector<288x128xf32>
    %47 = tpu.matmul %44, %46, %cst_42 {dimension_numbers = #tpu.dot_dimension_numbers<[1], [0], [0], [1], [0, 0, 1, 1], [], []>} : vector<288x8xbf16>, vector<8x128xbf16>, vector<288x128xf32> -> vector<288x128xf32>
    %48 = arith.addf %42, %47 : vector<288x128xf32>
    %c0_43 = arith.constant 0 : index
    %c38 = arith.constant 38 : index
    %c0_44 = arith.constant 0 : index
    %49 = vector.load %arg1[%c0_43, %c38, %c0_44] : memref<1x326x8xbf16, #tpu.memory_space<vmem>>, vector<1x288x8xbf16>
    %50 = vector.shape_cast %49 : vector<1x288x8xbf16> to vector<288x8xbf16>
    %c8 = arith.constant 8 : index
    %c0_45 = arith.constant 0 : index
    %c0_46 = arith.constant 0 : index
    %51 = vector.load %arg2[%c8, %c0_45, %c0_46] : memref<9x8x128xbf16, #tpu.memory_space<vmem>>, vector<1x8x128xbf16>
    %52 = vector.shape_cast %51 : vector<1x8x128xbf16> to vector<8x128xbf16>
    %cst_47 = arith.constant dense<0.000000e+00> : vector<288x128xf32>
    %53 = tpu.matmul %50, %52, %cst_47 {dimension_numbers = #tpu.dot_dimension_numbers<[1], [0], [0], [1], [0, 0, 1, 1], [], []>} : vector<288x8xbf16>, vector<8x128xbf16>, vector<288x128xf32> -> vector<288x128xf32>
    %54 = arith.addf %48, %53 : vector<288x128xf32>
    %c0_48 = arith.constant 0 : index
    %c0_49 = arith.constant 0 : index
    %55 = vector.load %arg3[%c0_48, %c0_49] : memref<1x128xf32, #tpu.memory_space<vmem>>, vector<1x128xf32>
    %56 = vector.broadcast %55 : vector<1x128xf32> to vector<288x128xf32>
    %57 = arith.mulf %54, %56 : vector<288x128xf32>
    %c0_50 = arith.constant 0 : index
    %c0_51 = arith.constant 0 : index
    %58 = vector.load %arg4[%c0_50, %c0_51] : memref<1x128xf32, #tpu.memory_space<vmem>>, vector<1x128xf32>
    %59 = vector.broadcast %58 : vector<1x128xf32> to vector<288x128xf32>
    %60 = arith.addf %57, %59 : vector<288x128xf32>
    %cst_52 = arith.constant 0.000000e+00 : f32
    %61 = vector.broadcast %cst_52 : f32 to vector<288x128xf32>
    %62 = arith.maximumf %60, %61 : vector<288x128xf32>
    %63 = arith.truncf %62 : vector<288x128xf32> to vector<288x128xbf16>
    %c0_53 = arith.constant 0 : index
    %c0_54 = arith.constant 0 : index
    %c0_55 = arith.constant 0 : index
    %64 = vector.load %arg5[%c0_53, %c0_54, %c0_55] : memref<1x288x128xbf16, #tpu.memory_space<vmem>>, vector<1x288x128xbf16>
    %65 = vector.shape_cast %64 : vector<1x288x128xbf16> to vector<288x128xbf16>
    %66 = vector.shape_cast %63 : vector<288x128xbf16> to vector<1x288x128xbf16>
    tpu.vector_store %arg5[%c0_53, %c0_54, %c0_55], %66 {strides = array<i32>} : memref<1x288x128xbf16, #tpu.memory_space<vmem>>, vector<1x288x128xbf16>,
    return
  }
  func.func @transform_0(%arg0: i32) -> (i32, i32, i32) {
    %c0_i32 = arith.constant 0 : i32
    %c0_i32_0 = arith.constant 0 : i32
    %c0_i32_1 = arith.constant 0 : i32
    return %arg0, %c0_i32, %c0_i32_0 : i32, i32, i32
  }
  func.func @transform_1(%arg0: i32) -> (i32, i32, i32) {
    %c0_i32 = arith.constant 0 : i32
    %c0_i32_0 = arith.constant 0 : i32
    %c0_i32_1 = arith.constant 0 : i32
    %c0_i32_2 = arith.constant 0 : i32
    return %c0_i32, %c0_i32_0, %c0_i32_1 : i32, i32, i32
  }
  func.func @transform_2(%arg0: i32) -> (i32, i32) {
    %c0_i32 = arith.constant 0 : i32
    %c0_i32_0 = arith.constant 0 : i32
    %c0_i32_1 = arith.constant 0 : i32
    return %c0_i32, %c0_i32_0 : i32, i32
  }
  func.func @transform_3(%arg0: i32) -> (i32, i32) {
    %c0_i32 = arith.constant 0 : i32
    %c0_i32_0 = arith.constant 0 : i32
    %c0_i32_1 = arith.constant 0 : i32
    return %c0_i32, %c0_i32_0 : i32, i32
  }
  func.func @transform_4(%arg0: i32) -> (i32, i32, i32) {
    %c0_i32 = arith.constant 0 : i32
    %c0_i32_0 = arith.constant 0 : i32
    %c0_i32_1 = arith.constant 0 : i32
    return %arg0, %c0_i32, %c0_i32_0 : i32, i32, i32
  }
}

</mosaic_0001>

<bundles_post_ra>
// kernel: tpu_custom_call.1
= control target key start
LH: loop header
LB: loop body
LE: loop exit
PB: predicated region body
PF: predicated region fallthrough
CT: control target
= control target key end

     0   :  { %9 = vsyncpa [#allocation3], 0  ;;  %s6509_s0 = inlined_call_operand.vmem [shape: bf16[2,326,8], index: 0, kind: input, shape index: {}]   ;;  %s6510_s1 = inlined_call_operand.vmem [shape: bf16[9,8,128], index: 1, kind: input, shape index: {}]   ;;  %s6511_s2 = inlined_call_operand.vmem [shape: f32[1,128], index: 2, kind: input, shape index: {}]   ;;  %s6512_s3 = inlined_call_operand.vmem [shape: f32[1,128], index: 3, kind: input, shape index: {}]   ;;  %s6513_s4 = inlined_call_operand.hbm [shape: bf16[2,288,128], index: 4, kind: output, shape index: {}]  }
   0x1   :  { %11 = vsyncpa [#allocation3 + $0x1], 0  ;;  %s5466_s15 = smov 0   ;;  %s5468_s16 = smov 0  }
   0x2   :  { %s5470_s17 = smov 0   ;;  %s5472_s18 = smov 0  }
   0x3 LB: > { %s5487_s19 = sadd.s32 4294967295, %s5436_s18   ;;  %s4023_s20 = sadd.s32 4294967294, %s5436_s18   ;;  %s5436_s18 = sphi %s5472_s18, %s6519_s18   ;;  %s5432_s17 = sphi %s5470_s17, %s6518_s17   ;;  %s5428_s16 = sphi %s5468_s16, %s6517_s16   ;;  %s5424_s15 = sphi %s5466_s15, %s6516_s15  }
   0x4   : > { %s5491_s21 = sadd.s32 1, %s5436_s18   ;;  %s113_s22 = sadd.s32 1, %s5432_s17 }
   0x5   : > { %s110_s23 = ssub.s32 %s5436_s18, %s5491_s21  ;;  %p123_p0 = scmp.ne.s32.totalorder %s5432_s17, %s5428_s16 }
   0x6   : > { %p111_p1 = scmp.eq.s32.totalorder %s110_s23, 0  ;;  %p124_p2 = scmp.eq.s32.totalorder %s5487_s19, 1 }
   0x7   : > { %p129_p3 = scmp.ne.s32.totalorder %s5428_s16, %s5424_s15  ;;  %p130_p4 = scmp.eq.s32.totalorder %s4023_s20, 1 }
   0x8   : > { %s5502_s24 = scalar_select %p111_p1, %s5432_s17, %s113_s22  }
   0x9   : > { %p5504_p5 = por %p124_p2, %p123_p0  ;;  %p5508_p6 = por %p130_p4, %p129_p3 }
   0xa   : > { %p4026_p7 = scmp.ge.s32.totalorder %s5436_s18, 1  ;;  %p165_p8 = scmp.lt.s32.totalorder %s5436_s18, 3 }
   0xc   : > { %p166_p9 = pnand %p4026_p7, %p165_p8 }
   0xd   : > { %vm534_vm0 = vcmask (!%p166_p9), 1043456   ;;  %v4142_v0 = vld [vmem:[%s6510_s1 + $0x10] sm:$0xf] (!%p166_p9)  ;;  %v4028_v1 = vld [vmem:[%s6510_s1 + $0x4] sm:$0xf] (!%p166_p9)  ;;  %p191_p10 = scmp.lt.s32.totalorder (!%p166_p9), %s5487_s19, 1 }
   0xe   : > { %169 = sbr.rel (%p166_p9) target bundleno = 600 (0x258), region = 36  ;;  %5251 = vmatprep.subr.msk.bf16.mxu0 (!%p166_p9), %vm534_vm0, %v4142_v0  ;;  %5247 = vmatprep.subr.msk.bf16.mxu1 (!%p166_p9), %vm534_vm0, %v4028_v1  ;;  %v5524_v2 = vsel (!%p166_p9), %vm534_vm0, %v4142_v0, 0  ;;  %v536_v3 = vsel (!%p166_p9), %vm534_vm0, %v4028_v1, 0  ;;  %v4162_v4 = vld [vmem:[%s6510_s1 + $0x14] sm:$0xf] (!%p166_p9)  ;;  %vm479_vm2 = vcmask (!%p166_p9), 64512  }
   0xf   : > { %4768 = vmatpush3.bf16.msra.mxu0 (!%p166_p9), %v5524_v2  ;;  %4616 = vmatpush3.bf16.msra.mxu1 (!%p166_p9), %v536_v3  ;;  %v233_v5 = vld [vmem:[%s6510_s1] sm:$0xf] (!%p166_p9)  ;;  %vm330_vm1 = vsmask.f32 (!%p166_p9), 7424  ;;  %v5543_v6 = vsel (!%p166_p9), %vm534_vm0, %v4162_v4, 0  ;;  %vm2137_vm4 = vcmask (!%p166_p9), 1045504  }
  0x10   : > { %5253 = vmatprep.subr.msk.bf16.mxu0 (!%p166_p9), %vm534_vm0, %v4162_v4  ;;  %5248 = vmatprep.subr.msk.bf16.mxu1 (!%p166_p9), %vm534_vm0, %v233_v5  ;;  %vm1690_vm3 = vsmask.f32 (!%p166_p9), 6400  ;;  %v752_v12 = vsel (!%p166_p9), %vm534_vm0, %v233_v5, 0  ;;  %v5591_v39 = vld [vmem:[%s6510_s1 + $0x8] sm:$0xf] (!%p166_p9)  ;;  %vm937_vm5 = vcmask (!%p166_p9), 1046528  }
  0x11   : > { %v5625_v1 = vld [vmem:[%s6510_s1 + $0x18] sm:$0xf] (!%p166_p9)  ;;  %vm2890_vm6 = vsmask.f32 (!%p166_p9), 5376  ;;  %vm3337_vm7 = vcmask (!%p166_p9), 1044480   ;;  %s5259_s22 = smul.u32 (!%p166_p9), 2304, %s5487_s19 }
  0x13   : > { %s6460_s29 = scalar_lea.hbm (!%p166_p9), %s6513_s4, %s5259_s22 }
  0x15   : > { %s192_s5 = scalar_select %p191_p10, %s5487_s19, 1 }
  0x17   : > { %s5258_s10 = smul.u32 164, %s192_s5  ;;  %s5438_s5 = smov [#allocation2]  }
  0x18   : > { %s5378_s6 = sshll.u32 %s5438_s5, 4  ;;  %s5379_s6 = int_to_ptr.vmem [resolvable:$false] %s5378_s6 }
  0x19   : > { %s5540_s13 = scalar_lea.vmem %s6509_s0, %s5258_s10  ;;  %s5380_s7 = scalar_lea.vmem %s5379_s6, 4608 }
  0x1a   : > { %v197_v7 = vld [vmem:[%s5540_s13] sm:$0xf]  ;;  %v5547_v8 = vld [vmem:[%s5540_s13 + $0x4] sm:$0xf]  ;;  %v5553_v10 = vld [vmem:[%s5540_s13 + $0x8] sm:$0xff]  }
  0x1b   : > { %v5550_v9 = vcombine.low %v197_v7, %v5547_v8  ;;  %v1245_v11 = vld [vmem:[%s5540_s13 + $0x8] sm:$0xe]  ;;  %v5558_v13 = vld [vmem:[%s5540_s13 + $0xc] sm:$0xf]  ;;  %v339_v16 = vshll.u32 %v5553_v10, 16  ;;  %v343_v17 = vshrl.u32 %v5553_v10, 16 }
  0x1c   : > { %v5565_v18 = vld [vmem:[%s5540_s13 + $0x10] sm:$0xff]   ;;  %v5571_v20 = vcombine.low %v1245_v11, %v5558_v13  ;;  %v5579_v28 = vld [vmem:[%s5540_s13 + $0x18] sm:$0xff]   ;;  %v5585_v34 = vld [vmem:[%s5540_s13 + $0x20] sm:$0xff]  }
  0x1d   : > { %v332_v14 = vshrl.u32 %v5550_v9, 16  ;;  %v334_v15 = vshll.u32 %v5550_v9, 16  ;;  %v5568_v19 = vld [vmem:[%s5540_s13 + $0x10] sm:$0xff]   ;;  %v341_v22 = vrot.slane %v339_v16, 1  ;;  %v1700_v23 = vshrl.u32 %v5565_v18, 16  ;;  %v5582_v33 = vld [vmem:[%s5540_s13 + $0x18] sm:$0xff]  }
  0x1e   : > { %v1703_v24 = vshll.u32 %v5565_v18, 16  ;;  %v1692_v25 = vshrl.u32 %v5571_v20, 16  ;;  %v1695_v26 = vshll.u32 %v5571_v20, 16  ;;  %v347_v27 = vshll.u32 %v5568_v19, 16  ;;  %v5600_v48 = vld [vmem:[%s5540_s13 + $0x20] sm:$0xff]   ;;  %v5603_v49 = vld [vmem:[%s5540_s13 + $0x28] sm:$0xff]  }
  0x1f   : > { %v336_v21 = vrot.slane %v334_v15, 1  ;;  %v345_v30 = vor.u32 %v343_v17, %v341_v22  ;;  %v1702_v31 = vrot.slane %v1700_v23, 1  ;;  %v1709_v38 = vshrl.u32 %v5579_v28, 16  ;;  %v5609_v54 = vld [vmem:[%s5540_s13 + $0x28] sm:$0xff]   ;;  %v5615_v59 = vld [vmem:[%s5540_s13 + $0x30] sm:$0xff]   ;;  %v5639_v23 = vld [vmem:[%s5540_s13 + $0x38] sm:$0xff]  }
  0x20   : > { %v1705_v32 = vrot.slane %v1703_v24, 2  ;;  %v1694_v35 = vrot.slane %v1692_v25, 1  ;;  %v1697_v36 = vrot.slane %v1695_v26, 2  ;;  %v349_v37 = vrot.slane %v347_v27, 1  ;;  %v5620_v0 = vld [vmem:[%s5540_s13 + $0x30] sm:$0xff]  }
  0x21   : > { %v337_v29 = vor.u32 %v336_v21, %v332_v14  ;;  %v1712_v42 = vshll.u32 %v5579_v28, 16  ;;  %v351_v43 = vshrl.u32 %v5568_v19, 16  ;;  %v1711_v46 = vrot.slane %v1709_v38, 1 }
  0x22   : > { %v1706_v41 = vor.u32 %v1705_v32, %v1702_v31  ;;  %v1698_v44 = vor.u32 %v1697_v36, %v1694_v35  ;;  %v350_v45 = vsel %vm330_vm1, %v345_v30, %v349_v37  ;;  %v355_v47 = vshll.u32 %v5582_v33, 16  ;;  %v5648_v35 = vld [vmem:[%s5540_s13 + $0x38] sm:$0xff]  }
  0x23   : > { %v342_v40 = vsel %vm330_vm1, %v337_v29, %v341_v22  ;;  %v1714_v50 = vrot.slane %v1712_v42, 2  ;;  %v353_v51 = vor.u32 %v351_v43, %v349_v37  ;;  %v1718_v52 = vshrl.u32 %v5585_v34, 16 }
  0x24   : > { %4617 = vmatprep.mubr.msk.bf16.mxu1 %vm479_vm2, %v342_v40  ;;  %v1721_v53 = vshll.u32 %v5585_v34, 16  ;;  %v1707_v55 = vsel %vm1690_vm3, %v1698_v44, %v1706_v41  ;;  %v357_v56 = vrot.slane %v355_v47, 1  ;;  %v359_v57 = vshrl.u32 %v5582_v33, 16  ;;  %v5659_v44 = vld [vmem:[%s5540_s13 + $0x40] sm:$0xff]  }
  0x25   : > { %4618 = vmatmul.mubr.msk.bf16.vlgmr.msra.gmra.mrb[0].mxu1 %vm479_vm2, %v350_v45  ;;  %v363_v58 = vshll.u32 %v5600_v48, 16  ;;  %4769 = vmatprep.mubr.msk.bf16.mxu0 %vm479_vm2, %v1707_v55  ;;  %v1715_v60 = vor.u32 %v1714_v50, %v1711_v46  ;;  %v1720_v61 = vrot.slane %v1718_v52, 1  ;;  %v1727_v63 = vshrl.u32 %v5603_v49, 16 }
  0x26   : > { %4654 = vmatpush3.bf16.msra.mxu1 %v752_v12  ;;  %v1723_v62 = vrot.slane %v1721_v53, 2  ;;  %v358_v3 = vsel %vm330_vm1, %v353_v51, %v357_v56  ;;  %v361_v4 = vor.u32 %v359_v57, %v357_v56  ;;  %v1730_v7 = vshll.u32 %v5603_v49, 16  ;;  %v5664_v51 = vld [vmem:[%s5540_s13 + $0x40] sm:$0xff]  }
  0x27   : > { %5249 = vmatprep.subr.msk.bf16.mxu1 %vm534_vm0, %v5591_v39  ;;  %v365_v5 = vrot.slane %v363_v58, 1  ;;  %v1716_v11 = vsel %vm1690_vm3, %v1706_v41, %v1715_v60  ;;  %4621 = vmatprep.mubr.msk.bf16.mxu1 %vm479_vm2, %v358_v3  ;;  %v1729_v14 = vrot.slane %v1727_v63, 1  ;;  %v367_v15 = vshrl.u32 %v5600_v48, 16  ;;  %v5675_v63 = vld [vmem:[%s5540_s13 + $0x48] sm:$0xff]  }
  0x28   : > { %v1724_v12 = vor.u32 %v1723_v62, %v1720_v61  ;;  %4770 = vmatmul.mubr.msk.bf16.vlgmr.msra.gmra.mrb[0].mxu0 %vm479_vm2, %v1716_v11  ;;  %v1732_v17 = vrot.slane %v1730_v7, 2  ;;  %v371_v21 = vshll.u32 %v5609_v54, 16  ;;  %v1736_v22 = vshrl.u32 %v5615_v59, 16  ;;  %v5672_v62 = vld [vmem:[%s5540_s13 + $0x48] sm:$0xff]  }
  0x29   : > { %v366_v16 = vsel %vm330_vm1, %v361_v4, %v365_v5  ;;  %4806 = vmatpush3.bf16.msra.mxu0 %v5543_v6  ;;  %v369_v25 = vor.u32 %v367_v15, %v365_v5  ;;  %v1739_v26 = vshll.u32 %v5615_v59, 16  ;;  %v375_v27 = vshrl.u32 %v5609_v54, 16 }
  0x2a   : > { %v1725_v24 = vsel %vm1690_vm3, %v1715_v60, %v1724_v12  ;;  %v1733_v29 = vor.u32 %v1732_v17, %v1729_v14  ;;  %v373_v30 = vrot.slane %v371_v21, 1  ;;  %v1738_v31 = vrot.slane %v1736_v22, 1  ;;  %5254 = vmatprep.subr.msk.bf16.mxu0 %vm534_vm0, %v5625_v1  ;;  %v5684_v14 = vld [vmem:[%s5540_s13 + $0x50] sm:$0xff]  }
  0x2b   : > { %4773 = vmatprep.mubr.msk.bf16.mxu0 %vm479_vm2, %v1725_v24  ;;  %v379_v32 = vshll.u32 %v5620_v0, 16  ;;  %v1741_v6 = vrot.slane %v1739_v26, 2  ;;  %v1745_v36 = vshrl.u32 %v5639_v23, 16  ;;  %v1748_v37 = vshll.u32 %v5639_v23, 16 }
  0x2c   : > { %v383_v38 = vshrl.u32 %v5620_v0, 16  ;;  %v1734_v40 = vsel %vm1690_vm3, %v1724_v12, %v1733_v29  ;;  %v374_v41 = vsel %vm330_vm1, %v369_v25, %v373_v30  ;;  %v377_v42 = vor.u32 %v375_v27, %v373_v30  ;;  %v5692_v25 = vld [vmem:[%s5540_s13 + $0x50] sm:$0xff]  }
  0x2d   : > { %4622 = vmatmul.mubr.msk.bf16.gmra.mrb[4].mxu1 %vm479_vm2, %v366_v16  ;;  %v381_v43 = vrot.slane %v379_v32, 1  ;;  %v1742_v45 = vor.u32 %v1741_v6, %v1738_v31  ;;  %v1747_v46 = vrot.slane %v1745_v36, 1  ;;  %v1750_v47 = vrot.slane %v1748_v37, 2 }
  0x2e   : > { %4625 = vmatprep.mubr.msk.bf16.mxu1 %vm479_vm2, %v374_v41  ;;  %v387_v50 = vshll.u32 %v5648_v35, 16  ;;  %v1754_v55 = vshrl.u32 %v5659_v44, 16  ;;  %v1757_v56 = vshll.u32 %v5659_v44, 16  ;;  %v391_v61 = vshrl.u32 %v5648_v35, 16  ;;  %v5702_v41 = vld [vmem:[%s5540_s13 + $0x58] sm:$0xff]  }
  0x2f   : > { %v382_v52 = vsel %vm330_vm1, %v377_v42, %v381_v43  ;;  %v385_v53 = vor.u32 %v383_v38, %v381_v43  ;;  %v1743_v57 = vsel %vm1690_vm3, %v1733_v29, %v1742_v45  ;;  %v1751_v58 = vor.u32 %v1750_v47, %v1747_v46  ;;  %v5697_v29 = vld [vmem:[%s5540_s13 + $0x58] sm:$0xff]  }
  0x30   : > { %v389_v60 = vrot.slane %v387_v50, 1  ;;  %4774 = vmatmul.mubr.msk.bf16.gmra.mrb[4].mxu0 %vm479_vm2, %v1734_v40  ;;  %v1756_v3 = vrot.slane %v1754_v55, 1  ;;  %v1759_v4 = vrot.slane %v1757_v56, 2  ;;  %v395_v5 = vshll.u32 %v5664_v51, 16 }
  0x31   : > { %v399_v7 = vshrl.u32 %v5664_v51, 16  ;;  %4777 = vmatprep.mubr.msk.bf16.mxu0 %vm479_vm2, %v1743_v57  ;;  %v1763_v12 = vshrl.u32 %v5672_v62, 16  ;;  %v1766_v16 = vshll.u32 %v5672_v62, 16  ;;  %v403_v17 = vshll.u32 %v5675_v63, 16  ;;  %v2131_v57 = vld [vmem:[%s5540_s13 + $0x8] sm:$0xc] }
  0x32   : > { %v390_v11 = vsel %vm330_vm1, %v385_v53, %v389_v60  ;;  %v1760_v15 = vor.u32 %v1759_v4, %v1756_v3  ;;  %v397_v21 = vrot.slane %v395_v5, 1  ;;  %v1772_v22 = vshrl.u32 %v5684_v14, 16 }
  0x33   : > { %v1775_v24 = vshll.u32 %v5684_v14, 16  ;;  %v1752_v26 = vsel %vm1690_vm3, %v1742_v45, %v1751_v58  ;;  %v393_v27 = vor.u32 %v391_v61, %v389_v60  ;;  %v1765_v30 = vrot.slane %v1763_v12, 1 }
  0x34   : > { %v1768_v31 = vrot.slane %v1766_v16, 2  ;;  %v401_v32 = vor.u32 %v399_v7, %v397_v21  ;;  %v405_v6 = vrot.slane %v403_v17, 1  ;;  %v1761_v36 = vsel %vm1690_vm3, %v1751_v58, %v1760_v15  ;;  %v5716_v58 = vld [vmem:[%s5540_s13 + $0x60] sm:$0xff]  }
  0x35   : > { %4626 = vmatmul.mubr.msk.bf16.gmra.mrb[8].mxu1 %vm479_vm2, %v382_v52  ;;  %v1774_v37 = vrot.slane %v1772_v22, 1  ;;  %v1777_v38 = vrot.slane %v1775_v24, 2  ;;  %v411_v40 = vshll.u32 %v5692_v25, 16  ;;  %v398_v42 = vsel %vm330_vm1, %v393_v27, %v397_v21 }
  0x36   : > { %4629 = vmatprep.mubr.msk.bf16.mxu1 %vm479_vm2, %v390_v11  ;;  %v407_v43 = vshrl.u32 %v5675_v63, 16  ;;  %v1781_v45 = vshrl.u32 %v5697_v29, 16  ;;  %v1784_v46 = vshll.u32 %v5697_v29, 16  ;;  %v1769_v47 = vor.u32 %v1768_v31, %v1765_v30  ;;  %v5721_v11 = vld [vmem:[%s5540_s13 + $0x68] sm:$0xff]  }
  0x37   : > { %v406_v50 = vsel %vm330_vm1, %v401_v32, %v405_v6  ;;  %v415_v52 = vshrl.u32 %v5692_v25, 16  ;;  %v419_v53 = vshll.u32 %v5702_v41, 16  ;;  %v1778_v55 = vor.u32 %v1777_v38, %v1774_v37  ;;  %v5738_v32 = vld [vmem:[%s5540_s13 + $0x70] sm:$0xff]  }
  0x38   : > { %4778 = vmatmul.mubr.msk.bf16.gmra.mrb[8].mxu0 %vm479_vm2, %v1752_v26  ;;  %v413_v56 = vrot.slane %v411_v40, 1  ;;  %v409_v60 = vor.u32 %v407_v43, %v405_v6  ;;  %v1783_v61 = vrot.slane %v1781_v45, 1  ;;  %v1786_v3 = vrot.slane %v1784_v46, 2  ;;  %v5744_v40 = vld [vmem:[%s5540_s13 + $0x78] sm:$0xff]  }
  0x39   : > { %4781 = vmatprep.mubr.msk.bf16.mxu0 %vm479_vm2, %v1761_v36  ;;  %v1770_v4 = vsel %vm1690_vm3, %v1760_v15, %v1769_v47  ;;  %v421_v7 = vrot.slane %v419_v53, 1  ;;  %v1779_v12 = vsel %vm1690_vm3, %v1769_v47, %v1778_v55  ;;  %v4163_v16 = vcombine.low %v2131_v57, %v5558_v13 }
  0x3a   : > { %v417_v5 = vor.u32 %v415_v52, %v413_v56  ;;  %v427_v17 = vshll.u32 %v5716_v58, 16  ;;  %v414_v21 = vsel %vm330_vm1, %v409_v60, %v413_v56  ;;  %v423_v22 = vshrl.u32 %v5702_v41, 16  ;;  %v5759_v56 = vld [vmem:[%s5540_s13 + $0x80] sm:$0xff]  }
  0x3b   : > { %v5730_v15 = vor.u32 %v1786_v3, %v1783_v61  ;;  %v431_v26 = vshrl.u32 %v5716_v58, 16  ;;  %v435_v27 = vshll.u32 %v5721_v11, 16  ;;  %v2138_v13 = vrot.slane %v4163_v16, 2 }
  0x3c   : > { %v422_v24 = vsel %vm330_vm1, %v417_v5, %v421_v7  ;;  %v2139_v30 = vrot.slane %v5565_v18, 2  ;;  %v429_v31 = vrot.slane %v427_v17, 1  ;;  %v425_v6 = vor.u32 %v423_v22, %v421_v7 }
  0x3d   : > { %4630 = vmatmul.mubr.msk.bf16.gmra.mrb[12].mxu1 %vm479_vm2, %v398_v42  ;;  %v1788_v36 = vsel %vm1690_vm3, %v1778_v55, %v5730_v15  ;;  %v437_v38 = vrot.slane %v435_v27, 1  ;;  %v443_v18 = vshll.u32 %v5738_v32, 16  ;;  %v2141_v45 = vrot.slane %v5579_v28, 2  ;;  %v5789_v27 = vld [vmem:[%s5540_s13 + $0x90] ss:$0 sps:$4 sm:$0x11]  }
  0x3e   : > { %4633 = vmatprep.mubr.msk.bf16.mxu1 %vm479_vm2, %v406_v50  ;;  %v433_v37 = vor.u32 %v431_v26, %v429_v31  ;;  %v2140_v42 = vsel %vm2137_vm4, %v2138_v13, %v2139_v30  ;;  %v430_v43 = vsel %vm330_vm1, %v425_v6, %v429_v31  ;;  %v439_v46 = vshrl.u32 %v5721_v11, 16 }
  0x3f   : > { %v447_v50 = vshrl.u32 %v5738_v32, 16  ;;  %v451_v52 = vshll.u32 %v5744_v40, 16  ;;  %v2143_v53 = vrot.slane %v5585_v34, 2  ;;  %v445_v55 = vrot.slane %v443_v18, 1  ;;  %v5772_v34 = vld [vmem:[%s6510_s1 + $0x1c] sm:$0xf] }
  0x40   : > { %4782 = vmatmul.mubr.msk.bf16.gmra.mrb[12].mxu0 %vm479_vm2, %v1770_v4  ;;  %v438_v47 = vsel %vm330_vm1, %v433_v37, %v437_v38  ;;  %v2669_v28 = vsel %vm534_vm0, %v5625_v1, 0  ;;  %v441_v57 = vor.u32 %v439_v46, %v437_v38  ;;  %v2142_v60 = vsel %vm2137_vm4, %v2139_v30, %v2141_v45  ;;  %v5766_v4 = vld [vmem:[%s5540_s13 + $0x88] sm:$0xff]  }
  0x41   : > { %4785 = vmatprep.mubr.msk.bf16.mxu0 %vm479_vm2, %v1779_v12  ;;  %v449_v61 = vor.u32 %v447_v50, %v445_v55  ;;  %v453_v3 = vrot.slane %v451_v52, 1  ;;  %v2144_v5 = vsel %vm2137_vm4, %v2141_v45, %v2143_v53  ;;  %v459_v7 = vshll.u32 %v5759_v56, 16 }
  0x42   : > { %v446_v1 = vsel %vm330_vm1, %v441_v57, %v445_v55  ;;  %v2145_v12 = vrot.slane %v5603_v49, 2  ;;  %v455_v16 = vshrl.u32 %v5744_v40, 16  ;;  %v467_v22 = vshll.u32 %v5766_v4, 16  ;;  %v5816_v55 = vld [vmem:[%s5540_s13 + $0x60] sm:$0xff]   ;;  %v5835_v57 = vld [vmem:[%s5540_s13 + $0x68] sm:$0xff]  }
  0x43   : > { %v454_v17 = vsel %vm330_vm1, %v449_v61, %v453_v3  ;;  %v461_v26 = vrot.slane %v459_v7, 1  ;;  %v475_v37 = vshll.u32 %v5789_v27, 16  ;;  %v2149_v38 = vrot.slane %v5639_v23, 2  ;;  %v5853_v7 = vld [vmem:[%s5540_s13 + $0x78] sm:$0xff]  }
  0x44   : > { %v457_v49 = vor.u32 %v455_v16, %v453_v3  ;;  %v2146_v13 = vsel %vm2137_vm4, %v2143_v53, %v2145_v12  ;;  %v469_v31 = vrot.slane %v467_v22, 1  ;;  %v2151_v18 = vrot.slane %v5659_v44, 2  ;;  %v5869_v22 = vld [vmem:[%s5540_s13 + $0x88] sm:$0xff]  }
  0x45   : > { %4634 = vmatmul.mubr.msk.bf16.gmra.mrb[16].mxu1 %vm479_vm2, %v414_v21  ;;  %v463_v21 = vshrl.u32 %v5759_v56, 16  ;;  %v477_v45 = vrot.slane %v475_v37, 1  ;;  %v2153_v23 = vrot.slane %v5672_v62, 2  ;;  %v2155_v44 = vrot.slane %v5684_v14, 2 }
  0x46   : > { %4637 = vmatprep.mubr.msk.bf16.mxu1 %vm479_vm2, %v422_v24  ;;  %v2147_v24 = vrot.slane %v5615_v59, 2  ;;  %v462_v59 = vsel %vm330_vm1, %v457_v49, %v461_v26  ;;  %v2157_v62 = vrot.slane %v5697_v29, 2  ;;  %v1030_v14 = vsel %vm534_vm0, %v5591_v39, 0 }
  0x47   : > { %v465_v30 = vor.u32 %v463_v21, %v461_v26  ;;  %v2154_v52 = vsel %vm2137_vm4, %v2151_v18, %v2153_v23  ;;  %v2156_v53 = vsel %vm2137_vm4, %v2153_v23, %v2155_v44  ;;  %v2161_v61 = vrot.slane %v5835_v57, 2  ;;  %v5873_v26 = vld [vmem:[%s5540_s13 + $0x90] sm:$0xff]  }
  0x48   : > { %4786 = vmatmul.mubr.msk.bf16.gmra.mrb[16].mxu0 %vm479_vm2, %v1788_v36  ;;  %v2148_v6 = vsel %vm2137_vm4, %v2145_v12, %v2147_v24  ;;  %v471_v36 = vshrl.u32 %v5766_v4, 16  ;;  %v2150_v46 = vsel %vm2137_vm4, %v2147_v24, %v2149_v38  ;;  %v2158_v29 = vsel %vm2137_vm4, %v2155_v44, %v2157_v62  ;;  %v5857_v12 = vld [vmem:[%s5540_s13 + $0x80] sm:$0xff]  }
  0x49   : > { %4807 = vmatprep.mubr.msk.bf16.mxu0 %vm479_vm2, %v2140_v42  ;;  %v470_v42 = vsel %vm330_vm1, %v465_v30, %v469_v31  ;;  %v2165_v16 = vrot.slane %v5853_v7, 2  ;;  %v2169_v49 = vrot.slane %v5869_v22, 2  ;;  %v2445_v30 = vld [vmem:[%s5540_s13 + $0x10] sm:$0xc] }
  0x4d   : > { %4638 = vmatmul.mubr.msk.bf16.gmra.mrb[20].mxu1 %vm479_vm2, %v430_v43  ;;  %v473_v43 = vor.u32 %v471_v36, %v469_v31  ;;  %v5883_v31 = vld [vmem:[%s5540_s13 + $0x14] sm:$0xf] }
  0x4e   : > { %4641 = vmatprep.mubr.msk.bf16.mxu1 %vm479_vm2, %v438_v47  ;;  %v2152_v47 = vsel %vm2137_vm4, %v2149_v38, %v2151_v18  ;;  %v5893_v37 = vcombine.low %v2445_v30, %v5883_v31  ;;  %v5896_v38 = vld [vmem:[%s5540_s13 + $0x18] sm:$0xff]  }
  0x4f   : > { %v478_v50 = vsel %vm330_vm1, %v473_v43, %v477_v45  ;;  %v2578_v43 = vrot.slane %v5896_v38, 2 }
  0x50   : > { %4808 = vmatmul.mubr.msk.bf16.vlgmr.msra.gmra.mrb[0].mxu0 %vm479_vm2, %v2142_v60  ;;  %v5841_v60 = vld [vmem:[%s5540_s13 + $0x70] sm:$0xff]   ;;  %v2577_v18 = vrot.slane %v5893_v37, 2 }
  0x51   : > { %4844 = vmatpush3.bf16.msra.mxu0 %v2669_v28  ;;  %4811 = vmatprep.mubr.msk.bf16.mxu0 %vm479_vm2, %v2144_v5  ;;  %v2159_v28 = vrot.slane %v5816_v55, 2  ;;  %v2163_v3 = vrot.slane %v5841_v60, 2 }
  0x52   : > { %5255 = vmatprep.subr.msk.bf16.mxu0 %vm534_vm0, %v5772_v34 }
  0x53   : > { %v2160_v39 = vsel %vm2137_vm4, %v2157_v62, %v2159_v28  ;;  %v2162_v5 = vsel %vm2137_vm4, %v2159_v28, %v2161_v61  ;;  %v2166_v21 = vsel %vm2137_vm4, %v2163_v3, %v2165_v16  ;;  %v3116_v62 = vsel %vm534_vm0, %v5772_v34, 0  ;;  %v5931_v28 = vld [vmem:[%s5540_s13 + $0x38] sm:$0xff]  }
  0x55   : > { %4642 = vmatmul.mubr.msk.bf16.gmra.mrb[24].mxu1 %vm479_vm2, %v446_v1  ;;  %v2164_v1 = vsel %vm2137_vm4, %v2161_v61, %v2163_v3  ;;  %v2586_v61 = vrot.slane %v5931_v28, 2  ;;  %v5950_v3 = vld [vmem:[%s5540_s13 + $0x40] sm:$0xff]  }
  0x56   : > { %4645 = vmatprep.mubr.msk.bf16.mxu1 %vm479_vm2, %v454_v17  ;;  %v2167_v17 = vrot.slane %v5857_v12, 2 }
  0x58   : > { %4812 = vmatmul.mubr.msk.bf16.gmra.mrb[4].mxu0 %vm479_vm2, %v2146_v13  ;;  %v2168_v24 = vsel %vm2137_vm4, %v2165_v16, %v2167_v17  ;;  %v2171_v13 = vrot.slane %v5873_v26, 2  ;;  %v931_v16 = vld [vmem:[%s5540_s13] sm:$0xe] }
  0x59   : > { %4815 = vmatprep.mubr.msk.bf16.mxu0 %vm479_vm2, %v2148_v6  ;;  %v2170_v6 = vsel %vm2137_vm4, %v2167_v17, %v2169_v49  ;;  %v2588_v17 = vrot.slane %v5950_v3, 2 }
  0x5a   : > { %v2172_v36 = vsel %vm2137_vm4, %v2169_v49, %v2171_v13 }
  0x5b   : > { %v2589_v49 = vsel %vm2137_vm4, %v2586_v61, %v2588_v17 }
  0x5d   : > { %4646 = vmatmul.mubr.msk.bf16.gmra.mrb[28].mxu1 %vm479_vm2, %v462_v59  ;;  %v5889_v59 = vld [vmem:[%s5540_s13 + $0x98] ss:$0 sps:$4 sm:$0x33]  }
  0x5e   : > { %4649 = vmatprep.mubr.msk.bf16.mxu1 %vm479_vm2, %v470_v42  ;;  %v2173_v42 = vrot.slane %v5889_v59, 2 }
  0x60   : > { %4816 = vmatmul.mubr.msk.bf16.gmra.mrb[8].mxu0 %vm479_vm2, %v2150_v46  ;;  %v2174_v45 = vsel %vm2137_vm4, %v2171_v13, %v2173_v42  ;;  %v5909_v46 = vld [vmem:[%s5540_s13 + $0x20] sm:$0xff]   ;;  %v5968_v13 = vld [vmem:[%s5540_s13 + $0x50] sm:$0xff]  }
  0x61   : > { %4819 = vmatprep.mubr.msk.bf16.mxu0 %vm479_vm2, %v2152_v47  ;;  %v2579_v47 = vsel %vm2137_vm4, %v2577_v18, %v2578_v43  ;;  %v2580_v23 = vrot.slane %v5909_v46, 2  ;;  %v2592_v42 = vrot.slane %v5968_v13, 2 }
  0x65   : > { %4650 = vmatmul.mubr.msk.bf16.gmra.mrb[32].mxu1 %vm479_vm2, %v478_v50  ;;  %v5913_v50 = vld [vmem:[%s5540_s13 + $0x28] sm:$0xff]  }
  0x66   : > { %4655 = vmatprep.mubr.msk.bf16.mxu1 %vm479_vm2, %v5550_v9  ;;  %v5827_v9 = vld [vmem:[%s6510_s1 + $0xc] sm:$0xf]  ;;  %v2582_v44 = vrot.slane %v5913_v50, 2 }
  0x68   : > { %4820 = vmatmul.mubr.msk.bf16.gmra.mrb[12].mxu0 %vm479_vm2, %v2154_v52  ;;  %v2581_v52 = vsel %vm2137_vm4, %v2578_v43, %v2580_v23 }
  0x69   : > { %4823 = vmatprep.mubr.msk.bf16.mxu0 %vm479_vm2, %v2156_v53  ;;  %v5925_v53 = vld [vmem:[%s5540_s13 + $0x30] sm:$0xff]  }
  0x6d   : > { %4656 = vmatmul.mubr.msk.bf16.vlgmr.msra.gmra.mrb[0].mxu1 %vm479_vm2, %v5553_v10 }
  0x6e   : > { %4659 = vmatprep.mubr.msk.bf16.mxu1 %vm479_vm2, %v5568_v19  ;;  %4692 = vmatpush3.bf16.msra.mxu1 %v1030_v14  ;;  %v2583_v14 = vsel %vm2137_vm4, %v2580_v23, %v2582_v44  ;;  %v943_v23 = vrot.slane %v5582_v33, 1 }
  0x6f   : > { %5250 = vmatprep.subr.msk.bf16.mxu1 %vm534_vm0, %v5827_v9 }
  0x70   : > { %4824 = vmatmul.mubr.msk.bf16.gmra.mrb[16].mxu0 %vm479_vm2, %v2158_v29  ;;  %v5936_v29 = vld [vmem:[%s6510_s1 + $0x20] sm:$0xf] }
  0x71   : > { %4827 = vmatprep.mubr.msk.bf16.mxu0 %vm479_vm2, %v2160_v39  ;;  %v2584_v39 = vrot.slane %v5925_v53, 2 }
  0x73   : > { %v2585_v34 = vsel %vm2137_vm4, %v2582_v44, %v2584_v39 }
  0x75   : > { %4660 = vmatmul.mubr.msk.bf16.gmra.mrb[4].mxu1 %vm479_vm2, %v5582_v33 }
  0x76   : > { %4663 = vmatprep.mubr.msk.bf16.mxu1 %vm479_vm2, %v5600_v48 }
  0x78   : > { %4828 = vmatmul.mubr.msk.bf16.gmra.mrb[20].mxu0 %vm479_vm2, %v2162_v5  ;;  %v2587_v5 = vsel %vm2137_vm4, %v2584_v39, %v2586_v61  ;;  %v1469_v39 = vsel %vm534_vm0, %v5827_v9, 0  ;;  %v945_v61 = vrot.slane %v5600_v48, 1  ;;  %v5363_v9 = vld [vmem:[%s6510_s1 + $0x10] sm:$0xf] }
  0x79   : > { %4831 = vmatprep.mubr.msk.bf16.mxu0 %vm479_vm2, %v2164_v1  ;;  %v5954_v1 = vld [vmem:[%s5540_s13 + $0x48] sm:$0xff]  }
  0x7a   : > { %v946_v48 = vsel %vm937_vm5, %v943_v23, %v945_v61 }
  0x7d   : > { %4664 = vmatmul.mubr.msk.bf16.gmra.mrb[8].mxu1 %vm479_vm2, %v5609_v54 }
  0x7e   : > { %4667 = vmatprep.mubr.msk.bf16.mxu1 %vm479_vm2, %v5620_v0 }
  0x80   : > { %4832 = vmatmul.mubr.msk.bf16.gmra.mrb[24].mxu0 %vm479_vm2, %v2166_v21  ;;  %v4085_v21 = vcombine.low %v931_v16, %v5547_v8  ;;  %v5973_v8 = vld [vmem:[%s5540_s13 + $0x58] sm:$0xff]   ;;  %v947_v16 = vrot.slane %v5609_v54, 1 }
  0x81   : > { %4835 = vmatprep.mubr.msk.bf16.mxu0 %vm479_vm2, %v2168_v24  ;;  %v2590_v24 = vrot.slane %v5954_v1, 2  ;;  %v2594_v43 = vrot.slane %v5973_v8, 2 }
  0x82   : > { %v938_v30 = vrot.slane %v4085_v21, 1  ;;  %v6015_v21 = vld [vmem:[%s5540_s13 + $0x78] sm:$0xff]   ;;  %v948_v54 = vsel %vm937_vm5, %v945_v61, %v947_v16 }
  0x83   : > { %v2595_v44 = vsel %vm2137_vm4, %v2592_v42, %v2594_v43 }
  0x85   : > { %4668 = vmatmul.mubr.msk.bf16.gmra.mrb[12].mxu1 %vm479_vm2, %v5648_v35 }
  0x86   : > { %4671 = vmatprep.mubr.msk.bf16.mxu1 %vm479_vm2, %v5664_v51 }
  0x88   : > { %4836 = vmatmul.mubr.msk.bf16.gmra.mrb[28].mxu0 %vm479_vm2, %v2170_v6  ;;  %v939_v6 = vrot.slane %v5553_v10, 1  ;;  %v941_v10 = vrot.slane %v5568_v19, 1 }
  0x89   : > { %4839 = vmatprep.mubr.msk.bf16.mxu0 %vm479_vm2, %v2172_v36  ;;  %v2591_v36 = vsel %vm2137_vm4, %v2588_v17, %v2590_v24 }
  0x8a   : > { %v940_v18 = vsel %vm937_vm5, %v938_v30, %v939_v6  ;;  %v949_v30 = vrot.slane %v5620_v0, 1 }
  0x8d   : > { %4672 = vmatmul.mubr.msk.bf16.gmra.mrb[16].mxu1 %vm479_vm2, %v5675_v63 }
  0x8e   : > { %4675 = vmatprep.mubr.msk.bf16.mxu1 %vm479_vm2, %v5692_v25 }
  0x90   : > { %4840 = vmatmul.mubr.msk.bf16.gmra.mrb[32].mxu0 %vm479_vm2, %v2174_v45  ;;  %v2593_v45 = vsel %vm2137_vm4, %v2590_v24, %v2592_v42  ;;  %v951_v42 = vrot.slane %v5648_v35, 1  ;;  %v953_v35 = vrot.slane %v5664_v51, 1 }
  0x91   : > { %4845 = vmatprep.mubr.msk.bf16.mxu0 %vm479_vm2, %v2579_v47  ;;  %v5986_v47 = vld [vmem:[%s5540_s13 + $0x60] sm:$0xff]  }
  0x92   : > { %v2596_v19 = vrot.slane %v5986_v47, 2 }
  0x95   : > { %4676 = vmatmul.mubr.msk.bf16.gmra.mrb[20].mxu1 %vm479_vm2, %v5702_v41 }
  0x96   : > { %4679 = vmatprep.mubr.msk.bf16.mxu1 %vm479_vm2, %v5716_v58 }
  0x98   : > { %4846 = vmatmul.mubr.msk.bf16.vlgmr.msra.gmra.mrb[0].mxu0 %vm479_vm2, %v2581_v52  ;;  %v5991_v52 = vld [vmem:[%s5540_s13 + $0x68] sm:$0xff]  }
  0x99   : > { %4882 = vmatpush3.bf16.msra.mxu0 %v3116_v62  ;;  %4849 = vmatprep.mubr.msk.bf16.mxu0 %vm479_vm2, %v2583_v14  ;;  %v942_v62 = vsel %vm937_vm5, %v939_v6, %v941_v10  ;;  %v944_v14 = vsel %vm937_vm5, %v941_v10, %v943_v23  ;;  %v2598_v33 = vrot.slane %v5991_v52, 2  ;;  %v950_v10 = vsel %vm937_vm5, %v947_v16, %v949_v30 }
  0x9a   : > { %5256 = vmatprep.subr.msk.bf16.mxu0 %vm534_vm0, %v5936_v29  ;;  %v2892_v16 = vshrl.u32 %v5893_v37, 16 }
  0x9b   : > { %v2599_v17 = vsel %vm2137_vm4, %v2596_v19, %v2598_v33 }
  0x9d   : > { %4680 = vmatmul.mubr.msk.bf16.gmra.mrb[24].mxu1 %vm479_vm2, %v5721_v11 }
  0x9e   : > { %4683 = vmatprep.mubr.msk.bf16.mxu1 %vm479_vm2, %v5738_v32 }
  0xa0   : > { %4850 = vmatmul.mubr.msk.bf16.gmra.mrb[4].mxu0 %vm479_vm2, %v2585_v34  ;;  %v2597_v34 = vsel %vm2137_vm4, %v2594_v43, %v2596_v19  ;;  %v6033_v43 = vld [vmem:[%s5540_s13 + $0x88] sm:$0xff]   ;;  %v955_v19 = vrot.slane %v5675_v63, 1  ;;  %v2895_v63 = vshll.u32 %v5893_v37, 16 }
  0xa1   : > { %4853 = vmatprep.mubr.msk.bf16.mxu0 %vm479_vm2, %v2587_v5  ;;  %v6006_v5 = vld [vmem:[%s5540_s13 + $0x70] sm:$0xff]   ;;  %v2606_v23 = vrot.slane %v6033_v43, 2 }
  0xa2   : > { %v2600_v24 = vrot.slane %v6006_v5, 2  ;;  %v956_v51 = vsel %vm937_vm5, %v953_v35, %v955_v19 }
  0xa4   : > { %v2601_v6 = vsel %vm2137_vm4, %v2598_v33, %v2600_v24  ;;  %v954_v33 = vsel %vm937_vm5, %v951_v42, %v953_v35 }
  0xa5   : > { %4684 = vmatmul.mubr.msk.bf16.gmra.mrb[28].mxu1 %vm479_vm2, %v5744_v40 }
  0xa6   : > { %4687 = vmatprep.mubr.msk.bf16.mxu1 %vm479_vm2, %v5759_v56 }
  0xa8   : > { %4854 = vmatmul.mubr.msk.bf16.gmra.mrb[8].mxu0 %vm479_vm2, %v2589_v49  ;;  %v2602_v49 = vrot.slane %v6015_v21, 2 }
  0xa9   : > { %4857 = vmatprep.mubr.msk.bf16.mxu0 %vm479_vm2, %v2591_v36  ;;  %v6028_v36 = vld [vmem:[%s5540_s13 + $0x80] sm:$0xff]  }
  0xaa   : > { %v2604_v0 = vrot.slane %v6028_v36, 2 }
  0xad   : > { %4688 = vmatmul.mubr.msk.bf16.gmra.mrb[32].mxu1 %vm479_vm2, %v5766_v4 }
  0xae   : > { %4693 = vmatprep.mubr.msk.bf16.mxu1 %vm479_vm2, %v940_v18  ;;  %v2603_v18 = vsel %vm2137_vm4, %v2600_v24, %v2602_v49 }
  0xb0   : > { %4858 = vmatmul.mubr.msk.bf16.gmra.mrb[12].mxu0 %vm479_vm2, %v2593_v45  ;;  %v952_v45 = vsel %vm937_vm5, %v949_v30, %v951_v42  ;;  %v959_v30 = vrot.slane %v5702_v41, 1  ;;  %v2897_v42 = vrot.slane %v2895_v63, 3  ;;  %v2918_v41 = vshrl.u32 %v5913_v50, 16 }
  0xb1   : > { %4861 = vmatprep.mubr.msk.bf16.mxu0 %vm479_vm2, %v2595_v44  ;;  %v2605_v44 = vsel %vm2137_vm4, %v2602_v49, %v2604_v0  ;;  %v5359_v49 = vld [vmem:[%s5540_s13 + $0xa0] ss:$0 sps:$4 sm:$0x33]  }
  0xb5   : > { %4694 = vmatmul.mubr.msk.bf16.vlgmr.msra.gmra.mrb[0].mxu1 %vm479_vm2, %v942_v62  ;;  %v6046_v62 = vld [vmem:[%s5540_s13 + $0x90] sm:$0xff]  }
  0xb6   : > { %4697 = vmatprep.mubr.msk.bf16.mxu1 %vm479_vm2, %v944_v14  ;;  %4730 = vmatpush3.bf16.msra.mxu1 %v1469_v39  ;;  %v6050_v14 = vld [vmem:[%s5540_s13 + $0x98] sm:$0xff]   ;;  %v2607_v39 = vsel %vm2137_vm4, %v2604_v0, %v2606_v23  ;;  %v2608_v61 = vrot.slane %v6046_v62, 2  ;;  %v2612_v0 = vrot.slane %v5359_v49, 2 }
  0xb7   : > { %5252 = vmatprep.subr.msk.bf16.mxu1 %vm534_vm0, %v5363_v9  ;;  %v2900_v9 = vshrl.u32 %v5896_v38, 16 }
  0xb8   : > { %4862 = vmatmul.mubr.msk.bf16.gmra.mrb[16].mxu0 %vm479_vm2, %v2597_v34  ;;  %v2610_v34 = vrot.slane %v6050_v14, 2  ;;  %v2609_v24 = vsel %vm2137_vm4, %v2606_v23, %v2608_v61  ;;  %v2912_v23 = vshll.u32 %v5909_v46, 16 }
  0xb9   : > { %4865 = vmatprep.mubr.msk.bf16.mxu0 %vm479_vm2, %v2599_v17  ;;  %v2903_v17 = vshll.u32 %v5896_v38, 16  ;;  %v2902_v37 = vrot.slane %v2900_v9, 2  ;;  %v2920_v9 = vrot.slane %v2918_v41, 2  ;;  %v2945_v41 = vshrl.u32 %v5950_v3, 16 }
  0xbd   : > { %4698 = vmatmul.mubr.msk.bf16.gmra.mrb[4].mxu1 %vm479_vm2, %v946_v48  ;;  %v957_v48 = vrot.slane %v5692_v25, 1 }
  0xbe   : > { %4701 = vmatprep.mubr.msk.bf16.mxu1 %vm479_vm2, %v948_v54  ;;  %v2611_v54 = vsel %vm2137_vm4, %v2608_v61, %v2610_v34 }
  0xbf   : > { %v960_v25 = vsel %vm937_vm5, %v957_v48, %v959_v30 }
  0xc0   : > { %4866 = vmatmul.mubr.msk.bf16.gmra.mrb[20].mxu0 %vm479_vm2, %v2601_v6  ;;  %v2894_v6 = vrot.slane %v2892_v16, 2  ;;  %v963_v16 = vrot.slane %v5721_v11, 1  ;;  %v2936_v11 = vshrl.u32 %v5931_v28, 16 }
  0xc1   : > { %4869 = vmatprep.mubr.msk.bf16.mxu0 %vm479_vm2, %v2603_v18  ;;  %v2905_v18 = vrot.slane %v2903_v17, 3 }
  0xc2   : > { %v2898_v35 = vor.u32 %v2897_v42, %v2894_v6  ;;  %v2939_v6 = vshll.u32 %v5931_v28, 16 }
  0xc5   : > { %4702 = vmatmul.mubr.msk.bf16.gmra.mrb[8].mxu1 %vm479_vm2, %v950_v10  ;;  %v958_v10 = vsel %vm937_vm5, %v955_v19, %v957_v48  ;;  %v961_v19 = vrot.slane %v5716_v58, 1  ;;  %v2927_v58 = vshrl.u32 %v5925_v53, 16 }
  0xc6   : > { %4705 = vmatprep.mubr.msk.bf16.mxu1 %vm479_vm2, %v952_v45  ;;  %v2909_v45 = vshrl.u32 %v5909_v46, 16 }
  0xc7   : > { %v962_v48 = vsel %vm937_vm5, %v959_v30, %v961_v19  ;;  %v965_v30 = vrot.slane %v5738_v32, 1  ;;  %v2948_v32 = vshll.u32 %v5950_v3, 16 }
  0xc8   : > { %4870 = vmatmul.mubr.msk.bf16.gmra.mrb[24].mxu0 %vm479_vm2, %v2605_v44  ;;  %v2906_v44 = vor.u32 %v2905_v18, %v2902_v37  ;;  %v2911_v61 = vrot.slane %v2909_v45, 2  ;;  %v2929_v37 = vrot.slane %v2927_v58, 2  ;;  %v2938_v45 = vrot.slane %v2936_v11, 2 }
  0xc9   : > { %4873 = vmatprep.mubr.msk.bf16.mxu0 %vm479_vm2, %v2607_v39  ;;  %v2921_v39 = vshll.u32 %v5913_v50, 16  ;;  %v2963_v58 = vshrl.u32 %v5968_v13, 16  ;;  %v2975_v11 = vshll.u32 %v5973_v8, 16 }
  0xca   : > { %v2907_v63 = vsel %vm2890_vm6, %v2898_v35, %v2906_v44  ;;  %v966_v35 = vsel %vm937_vm5, %v963_v16, %v965_v30 }
  0xcb   : > { %v2923_v17 = vrot.slane %v2921_v39, 3 }
  0xcd   : > { %4706 = vmatmul.mubr.msk.bf16.gmra.mrb[12].mxu1 %vm479_vm2, %v954_v33  ;;  %v2613_v33 = vsel %vm2137_vm4, %v2610_v34, %v2612_v0  ;;  %v2930_v34 = vshll.u32 %v5925_v53, 16  ;;  %v2924_v49 = vor.u32 %v2923_v17, %v2920_v9  ;;  %v3430_v0 = vsel %vm534_vm0, %v5936_v29, 0 }
  0xce   : > { %4709 = vmatprep.mubr.msk.bf16.mxu1 %vm479_vm2, %v956_v51  ;;  %v2914_v51 = vrot.slane %v2912_v23, 3  ;;  %v2941_v23 = vrot.slane %v2939_v6, 3  ;;  %v2954_v29 = vshrl.u32 %v5954_v1, 16 }
  0xcf   : > { %v2932_v18 = vrot.slane %v2930_v34, 3  ;;  %v2966_v34 = vshll.u32 %v5968_v13, 16 }
  0xd0   : > { %4874 = vmatmul.mubr.msk.bf16.gmra.mrb[28].mxu0 %vm479_vm2, %v2609_v24  ;;  %v2915_v24 = vor.u32 %v2914_v51, %v2911_v61  ;;  %v2942_v39 = vor.u32 %v2941_v23, %v2938_v45  ;;  %v2947_v61 = vrot.slane %v2945_v41, 2  ;;  %v2950_v51 = vrot.slane %v2948_v32, 3 }
  0xd1   : > { %4877 = vmatprep.mubr.msk.bf16.mxu0 %vm479_vm2, %v2611_v54  ;;  %v964_v54 = vsel %vm937_vm5, %v961_v19, %v963_v16  ;;  %v2957_v19 = vshll.u32 %v5954_v1, 16  ;;  %v2956_v17 = vrot.slane %v2954_v29, 2  ;;  %v2977_v23 = vrot.slane %v2975_v11, 3  ;;  %v5365_v29 = vld [vmem:[%s5540_s13 + $0x18] sm:$0xff]  }
  0xd2   : > { %v2916_v42 = vsel %vm2890_vm6, %v2906_v44, %v2915_v24  ;;  %v2933_v44 = vor.u32 %v2932_v18, %v2929_v37  ;;  %v2968_v37 = vrot.slane %v2966_v34, 3  ;;  %v1377_v18 = vrot.slane %v5571_v20, 1 }
  0xd3   : > { %v2981_v32 = vshrl.u32 %v5986_v47, 16  ;;  %v2984_v20 = vshll.u32 %v5986_v47, 16  ;;  %v3002_v34 = vshll.u32 %v6006_v5, 16  ;;  %v3011_v11 = vshll.u32 %v6015_v21, 16 }
  0xd4   : > { %v2934_v16 = vsel %vm2890_vm6, %v2924_v49, %v2933_v44  ;;  %v2943_v9 = vsel %vm2890_vm6, %v2933_v44, %v2942_v39 }
  0xd5   : > { %4710 = vmatmul.mubr.msk.bf16.gmra.mrb[16].mxu1 %vm479_vm2, %v958_v10  ;;  %v967_v10 = vrot.slane %v5744_v40, 1 }
  0xd6   : > { %4713 = vmatprep.mubr.msk.bf16.mxu1 %vm479_vm2, %v960_v25  ;;  %v2925_v25 = vsel %vm2890_vm6, %v2915_v24, %v2924_v49 }
  0xd7   : > { %v968_v40 = vsel %vm937_vm5, %v965_v30, %v967_v10  ;;  %v973_v30 = vrot.slane %v5789_v27, 1 }
  0xd8   : > { %4878 = vmatmul.mubr.msk.bf16.gmra.mrb[32].mxu0 %vm479_vm2, %v2613_v33  ;;  %v969_v33 = vrot.slane %v5759_v56, 1 }
  0xd9   : > { %4883 = vmatprep.mubr.msk.bf16.mxu0 %vm479_vm2, %v2907_v63  ;;  %v971_v63 = vrot.slane %v5766_v4, 1  ;;  %v2972_v4 = vshrl.u32 %v5973_v8, 16 }
  0xda   : > { %v970_v24 = vsel %vm937_vm5, %v967_v10, %v969_v33  ;;  %v5364_v10 = vld [vmem:[%s5540_s13 + $0x10] sm:$0xff]  }
  0xdb   : > { %v972_v56 = vsel %vm937_vm5, %v969_v33, %v971_v63  ;;  %v2974_v45 = vrot.slane %v2972_v4, 2  ;;  %v3008_v4 = vshrl.u32 %v6015_v21, 16 }
  0xdd   : > { %4714 = vmatmul.mubr.msk.bf16.gmra.mrb[20].mxu1 %vm479_vm2, %v962_v48  ;;  %v2959_v48 = vrot.slane %v2957_v19, 3  ;;  %v2978_v44 = vor.u32 %v2977_v23, %v2974_v45  ;;  %v1380_v19 = vrot.slane %v5365_v29, 1  ;;  %v3010_v45 = vrot.slane %v3008_v4, 2 }
  0xde   : > { %4717 = vmatprep.mubr.msk.bf16.mxu1 %vm479_vm2, %v964_v54  ;;  %v2951_v54 = vor.u32 %v2950_v51, %v2947_v61  ;;  %v2983_v61 = vrot.slane %v2981_v32, 2  ;;  %v2986_v51 = vrot.slane %v2984_v20, 3  ;;  %v3013_v23 = vrot.slane %v3011_v11, 3  ;;  %v5371_v11 = vld [vmem:[%s5540_s13 + $0x48] sm:$0xff]  }
  0xdf   : > { %v2960_v49 = vor.u32 %v2959_v48, %v2956_v17  ;;  %v3020_v32 = vshll.u32 %v6028_v36, 16  ;;  %v3047_v4 = vshll.u32 %v6050_v14, 16 }
  0xe0   : > { %4884 = vmatmul.mubr.msk.bf16.vlgmr.msra.gmra.mrb[0].mxu0 %vm479_vm2, %v2916_v42  ;;  %v2952_v6 = vsel %vm2890_vm6, %v2942_v39, %v2951_v54  ;;  %v2965_v42 = vrot.slane %v2963_v58, 2  ;;  %v2993_v39 = vshll.u32 %v5991_v52, 16  ;;  %v2999_v58 = vshrl.u32 %v6006_v5, 16 }
  0xe1   : > { %4920 = vmatpush3.bf16.msra.mxu0 %v3430_v0  ;;  %4887 = vmatprep.mubr.msk.bf16.mxu0 %vm479_vm2, %v2925_v25  ;;  %v1378_v0 = vrot.slane %v5364_v10, 1  ;;  %v2961_v25 = vsel %vm2890_vm6, %v2951_v54, %v2960_v49  ;;  %v2987_v54 = vor.u32 %v2986_v51, %v2983_v61  ;;  %v5368_v10 = vld [vmem:[%s5540_s13 + $0x30] sm:$0xff]   ;;  %v3014_v20 = vor.u32 %v3013_v23, %v3010_v45  ;;  %v5370_v51 = vld [vmem:[%s5540_s13 + $0x40] sm:$0xff]  }
  0xe2   : > { %v2969_v41 = vor.u32 %v2968_v37, %v2965_v42  ;;  %v2995_v48 = vrot.slane %v2993_v39, 3  ;;  %v3001_v37 = vrot.slane %v2999_v58, 2  ;;  %v5369_v39 = vld [vmem:[%s5540_s13 + $0x38] sm:$0xff]   ;;  %v3022_v61 = vrot.slane %v3020_v32, 3 }
  0xe3   : > { %v1379_v27 = vsel %vm937_vm5, %v1377_v18, %v1378_v0  ;;  %v2988_v42 = vsel %vm2890_vm6, %v2978_v44, %v2987_v54  ;;  %v3004_v18 = vrot.slane %v3002_v34, 3  ;;  %v1388_v29 = vrot.slane %v5369_v39, 1 }
  0xe4   : > { %v2970_v33 = vsel %vm2890_vm6, %v2960_v49, %v2969_v41  ;;  %v3038_v58 = vshll.u32 %v6046_v62, 16  ;;  %v3049_v23 = vrot.slane %v3047_v4, 3  ;;  %v3343_v4 = vrot.slane %v5913_v50, 3 }
  0xe5   : > { %4718 = vmatmul.mubr.msk.bf16.gmra.mrb[24].mxu1 %vm479_vm2, %v966_v35  ;;  %v974_v35 = vsel %vm937_vm5, %v971_v63, %v973_v30  ;;  %v3345_v50 = vrot.slane %v5925_v53, 3 }
  0xe6   : > { %4721 = vmatprep.mubr.msk.bf16.mxu1 %vm479_vm2, %v968_v40  ;;  %v2990_v40 = vshrl.u32 %v5991_v52, 16 }
  0xe8   : > { %4888 = vmatmul.mubr.msk.bf16.gmra.mrb[4].mxu0 %vm479_vm2, %v2934_v16  ;;  %v5366_v16 = vld [vmem:[%s5540_s13 + $0x20] sm:$0xff]   ;;  %v2992_v17 = vrot.slane %v2990_v40, 2  ;;  %v3029_v40 = vshll.u32 %v6033_v43, 16 }
  0xe9   : > { %4891 = vmatprep.mubr.msk.bf16.mxu0 %vm479_vm2, %v2943_v9  ;;  %v1382_v63 = vrot.slane %v5366_v16, 1  ;;  %v2979_v9 = vsel %vm2890_vm6, %v2969_v41, %v2978_v44  ;;  %v3005_v41 = vor.u32 %v3004_v18, %v3001_v37  ;;  %v3026_v44 = vshrl.u32 %v6033_v43, 16  ;;  %v5372_v18 = vld [vmem:[%s5540_s13 + $0x50] sm:$0xff]  }
  0xea   : > { %v2996_v49 = vor.u32 %v2995_v48, %v2992_v17  ;;  %v1390_v16 = vrot.slane %v5370_v51, 1  ;;  %v3031_v17 = vrot.slane %v3029_v40, 3  ;;  %v3040_v37 = vrot.slane %v3038_v58, 3  ;;  %v5373_v40 = vld [vmem:[%s5540_s13 + $0x58] sm:$0xff]  }
  0xeb   : > { %v1396_v39 = vrot.slane %v5373_v40, 1  ;;  %v1799_v40 = vshrl.u32 %v5835_v57, 16 }
  0xed   : > { %4722 = vmatmul.mubr.msk.bf16.gmra.mrb[28].mxu1 %vm479_vm2, %v970_v24  ;;  %v1381_v24 = vsel %vm937_vm5, %v1378_v0, %v1380_v19  ;;  %v1386_v0 = vrot.slane %v5368_v10, 1  ;;  %v1394_v10 = vrot.slane %v5372_v18, 1  ;;  %v3347_v18 = vrot.slane %v5931_v28, 3 }
  0xee   : > { %4725 = vmatprep.mubr.msk.bf16.mxu1 %vm479_vm2, %v972_v56  ;;  %v1383_v56 = vsel %vm937_vm5, %v1380_v19, %v1382_v63  ;;  %v3006_v19 = vsel %vm2890_vm6, %v2996_v49, %v3005_v41 }
  0xef   : > { %v1389_v48 = vsel %vm937_vm5, %v1386_v0, %v1388_v29  ;;  %v3348_v53 = vsel %vm3337_vm7, %v3345_v50, %v3347_v18 }
  0xf0   : > { %4892 = vmatmul.mubr.msk.bf16.gmra.mrb[8].mxu0 %vm479_vm2, %v2952_v6  ;;  %v5367_v6 = vld [vmem:[%s5540_s13 + $0x28] sm:$0xff]  }
  0xf1   : > { %4895 = vmatprep.mubr.msk.bf16.mxu0 %vm479_vm2, %v2961_v25  ;;  %v1384_v30 = vrot.slane %v5367_v6, 1  ;;  %v2997_v25 = vsel %vm2890_vm6, %v2987_v54, %v2996_v49  ;;  %v1391_v54 = vsel %vm937_vm5, %v1388_v29, %v1390_v16  ;;  %v3044_v49 = vshrl.u32 %v6050_v14, 16 }
  0xf2   : > { %v1392_v6 = vrot.slane %v5371_v11, 1  ;;  %v1404_v11 = vrot.slane %v5853_v7, 1 }
  0xf3   : > { %v3046_v45 = vrot.slane %v3044_v49, 2 }
  0xf5   : > { %4726 = vmatmul.mubr.msk.bf16.gmra.mrb[32].mxu1 %vm479_vm2, %v974_v35  ;;  %v1385_v35 = vsel %vm937_vm5, %v1382_v63, %v1384_v30  ;;  %v3015_v63 = vsel %vm2890_vm6, %v3005_v41, %v3014_v20 }
  0xf6   : > { %4731 = vmatprep.mubr.msk.bf16.mxu1 %vm479_vm2, %v1379_v27  ;;  %v3017_v27 = vshrl.u32 %v6028_v36, 16 }
  0xf8   : > { %4896 = vmatmul.mubr.msk.bf16.gmra.mrb[12].mxu0 %vm479_vm2, %v2970_v33  ;;  %v3019_v33 = vrot.slane %v3017_v27, 2 }
  0xf9   : > { %4899 = vmatprep.mubr.msk.bf16.mxu0 %vm479_vm2, %v2979_v9  ;;  %v3028_v9 = vrot.slane %v3026_v44, 2  ;;  %v3331_v44 = vld [vmem:[%s5540_s13 + $0x10] sm:$0x8] }
  0xfb   : > { %v3032_v34 = vor.u32 %v3031_v17, %v3028_v9 }
  0xfd   : > { %4732 = vmatmul.mubr.msk.bf16.vlgmr.msra.gmra.mrb[0].mxu1 %vm479_vm2, %v1381_v24  ;;  %v3023_v24 = vor.u32 %v3022_v61, %v3019_v33  ;;  %v1398_v61 = vrot.slane %v5816_v55, 1 }
  0xfe   : > { %4735 = vmatprep.mubr.msk.bf16.mxu1 %vm479_vm2, %v1383_v56  ;;  %4958 = vmatpush3.bf16.msra.mxu1 %v5524_v2  ;;  %v1387_v2 = vsel %vm937_vm5, %v1384_v30, %v1386_v0  ;;  %v3035_v56 = vshrl.u32 %v6046_v62, 16  ;;  %v6186_v0 = vld [vmem:[%s5540_s13 + $0xa0] ss:$0 sps:$4 sm:$0x77]  }
  0xff   : > { %v3024_v30 = vsel %vm2890_vm6, %v3014_v20, %v3023_v24  ;;  %v3053_v27 = vshrl.u32 %v6186_v0, 16  ;;  %v3056_v32 = vshll.u32 %v6186_v0, 16  ;;  %v3050_v20 = vor.u32 %v3049_v23, %v3046_v45 }
 0x100   : > { %4900 = vmatmul.mubr.msk.bf16.gmra.mrb[16].mxu0 %vm479_vm2, %v2988_v42  ;;  %v3037_v42 = vrot.slane %v3035_v56, 2  ;;  %v1399_v17 = vsel %vm937_vm5, %v1396_v39, %v1398_v61  ;;  %v1402_v56 = vrot.slane %v5841_v60, 1  ;;  %v1410_v45 = vrot.slane %v5873_v26, 1 }
 0x101   : > { %4903 = vmatprep.mubr.msk.bf16.mxu0 %vm479_vm2, %v2997_v25  ;;  %v3033_v25 = vsel %vm2890_vm6, %v3023_v24, %v3032_v34  ;;  %v3058_v33 = vrot.slane %v3056_v32, 3  ;;  %v3339_v24 = vrot.slane %v5896_v38, 3  ;;  %v3341_v38 = vrot.slane %v5909_v46, 3 }
 0x102   : > { %v3041_v41 = vor.u32 %v3040_v37, %v3037_v42  ;;  %v1405_v46 = vsel %vm937_vm5, %v1402_v56, %v1404_v11  ;;  %v1790_v23 = vshrl.u32 %v5816_v55, 16 }
 0x103   : > { %v3344_v42 = vsel %vm3337_vm7, %v3341_v38, %v3343_v4 }
 0x104   : > { %v3042_v29 = vsel %vm2890_vm6, %v3032_v34, %v3041_v41  ;;  %v3051_v51 = vsel %vm2890_vm6, %v3041_v41, %v3050_v20  ;;  %v5362_v41 = vld [vmem:[%s5540_s13 + $0x98] ss:$0 sps:$4 sm:$0x11]   ;;  %v1792_v32 = vrot.slane %v1790_v23, 1  ;;  %s188_s13 = sand.u32 1, %s5428_s16  }
 0x105   : > { %4736 = vmatmul.mubr.msk.bf16.gmra.mrb[4].mxu1 %vm479_vm2, %v1385_v35  ;;  %v1393_v35 = vsel %vm937_vm5, %v1390_v16, %v1392_v6  ;;  %v4241_v16 = vcombine.low %v3331_v44, %v5883_v31  ;;  %v3351_v44 = vrot.slane %v5954_v1, 3  ;;  %s5257_s14 = smul.u32 144, %s188_s13  ;;  %s6468_s19 = scalar_lea.sflag [#allocation3], %s188_s13 }
 0x106   : > { %4739 = vmatprep.mubr.msk.bf16.mxu1 %vm479_vm2, %v1387_v2  ;;  %v1395_v2 = vsel %vm937_vm5, %v1392_v6, %v1394_v10  ;;  %v3342_v6 = vsel %vm3337_vm7, %v3339_v24, %v3341_v38 }
 0x107   : > { %s6364_s20 = scalar_lea.vmem [#allocation2], %s5257_s14 }
 0x108   : > { %4904 = vmatmul.mubr.msk.bf16.gmra.mrb[20].mxu0 %vm479_vm2, %v3006_v19  ;;  %v3055_v19 = vrot.slane %v3053_v27, 2  ;;  %s3961_s23 = sshll.u32 %s6364_s20, 4  ;;  %s6462_s23 = int_to_ptr.vmem [resolvable:$true] %s3961_s23 }
 0x109   : > { %4907 = vmatprep.mubr.msk.bf16.mxu0 %vm479_vm2, %v3015_v63  ;;  %v1397_v63 = vsel %vm937_vm5, %v1394_v10, %v1396_v39  ;;  %v1408_v10 = vrot.slane %v5869_v22, 1  ;;  %v1802_v39 = vshll.u32 %v5835_v57, 16  ;;  %s5374_s30 = scalar_lea.vmem %s6462_s23, 2304  ;;  %p5381_p0 = scmp.lt.s32.totalorder %s6462_s23, %s5379_s6 }
 0x10a   : > { %v3059_v9 = vor.u32 %v3058_v33, %v3055_v19  ;;  %v1811_v33 = vshll.u32 %v5841_v60, 16  ;;  %p5375_p11 = scmp.ne.s32.totalorder %s6462_s23, %s5374_s30  ;;  %p5382_p1 = scmp.lt.s32.totalorder %s5380_s7, %s5374_s30 }
 0x10b   : > { %v1411_v27 = vsel %vm937_vm5, %v1408_v10, %v1410_v45 }
 0x10c   : > { %v3060_v31 = vsel %vm2890_vm6, %v3050_v20, %v3059_v9  ;;  %p5376_p12 = pnand %p5375_p11, %p5504_p5  ;;  %p5383_p2 = por %p5382_p1, %p5381_p0 }
 0x10d   : > { %4740 = vmatmul.mubr.msk.bf16.gmra.mrb[8].mxu1 %vm479_vm2, %v1389_v48  ;;  %v3338_v48 = vrot.slane %v4241_v16, 3  ;;  %v1804_v16 = vrot.slane %v1802_v39, 2 }
 0x10e   : > { %4743 = vmatprep.mubr.msk.bf16.mxu1 %vm479_vm2, %v1391_v54  ;;  %v1400_v54 = vrot.slane %v5835_v57, 1  ;;  %p5377_p13 = pneg %p5376_p12 }
 0x10f   : > { %v3340_v58 = vsel %vm3337_vm7, %v3338_v48, %v3339_v24  ;;  %v3355_v48 = vrot.slane %v5973_v8, 3  ;;  %v1817_v24 = vshrl.u32 %v5853_v7, 16 }
 0x110   : > { %4908 = vmatmul.mubr.msk.bf16.gmra.mrb[24].mxu0 %vm479_vm2, %v3024_v30  ;;  %v1401_v34 = vsel %vm937_vm5, %v1398_v61, %v1400_v54  ;;  %v1403_v49 = vsel %vm937_vm5, %v1400_v54, %v1402_v56  ;;  %v1406_v30 = vrot.slane %v5857_v12, 1  ;;  %v1820_v54 = vshll.u32 %v5853_v7, 16  ;;  %p5384_p3 = pnand %p5383_p2, %p5377_p13 }
 0x111   : > { %4911 = vmatprep.mubr.msk.bf16.mxu0 %vm479_vm2, %v3033_v25  ;;  %v3346_v25 = vsel %vm3337_vm7, %v3343_v4, %v3345_v50 }
 0x112   : > { %v1407_v37 = vsel %vm937_vm5, %v1404_v11, %v1406_v30  ;;  %v1409_v28 = vsel %vm937_vm5, %v1406_v30, %v1408_v10  ;;  %v1822_v38 = vrot.slane %v1820_v54, 2  ;;  %v1835_v30 = vshrl.u32 %v5869_v22, 16 }
 0x114   : > { %v1837_v10 = vrot.slane %v1835_v30, 1 }
 0x115   : > { %4744 = vmatmul.mubr.msk.bf16.gmra.mrb[12].mxu1 %vm479_vm2, %v1393_v35  ;;  %v1793_v35 = vshll.u32 %v5816_v55, 16  ;;  %v1412_v55 = vrot.slane %v5362_v41, 1  ;;  %v1856_v41 = vshll.u32 %v5889_v59, 16 }
 0x116   : > { %4747 = vmatprep.mubr.msk.bf16.mxu1 %vm479_vm2, %v1395_v2  ;;  %v3349_v2 = vrot.slane %v5950_v3, 3  ;;  %v1808_v3 = vshrl.u32 %v5841_v60, 16 }
 0x117   : > { %v1795_v20 = vrot.slane %v1793_v35, 2  ;;  %v1413_v1 = vsel %vm937_vm5, %v1410_v45, %v1412_v55  ;;  %v3361_v45 = vrot.slane %v6006_v5, 3 }
 0x118   : > { %4912 = vmatmul.mubr.msk.bf16.gmra.mrb[28].mxu0 %vm479_vm2, %v3042_v29  ;;  %v3350_v29 = vsel %vm3337_vm7, %v3347_v18, %v3349_v2  ;;  %v3352_v61 = vsel %vm3337_vm7, %v3349_v2, %v3351_v44  ;;  %v1810_v9 = vrot.slane %v1808_v3, 1  ;;  %v3371_v3 = vrot.slane %v6050_v14, 3 }
 0x119   : > { %4915 = vmatprep.mubr.msk.bf16.mxu0 %vm479_vm2, %v3051_v51  ;;  %v1796_v19 = vor.u32 %v1795_v20, %v1792_v32  ;;  %v1801_v51 = vrot.slane %v1799_v40, 1  ;;  %v3367_v40 = vrot.slane %v6033_v43, 3 }
 0x11b   : > { %v1797_v57 = vsel %vm1690_vm3, %v5730_v15, %v1796_v19  ;;  %v1805_v60 = vor.u32 %v1804_v16, %v1801_v51  ;;  %v1829_v15 = vshll.u32 %v5857_v12, 16 }
 0x11d   : > { %4748 = vmatmul.mubr.msk.bf16.gmra.mrb[16].mxu1 %vm479_vm2, %v1397_v63  ;;  %v3353_v63 = vrot.slane %v5968_v13, 3  ;;  %v1826_v13 = vshrl.u32 %v5857_v12, 16  ;;  %v1806_v8 = vsel %vm1690_vm3, %v1796_v19, %v1805_v60  ;;  %v1831_v11 = vrot.slane %v1829_v15, 2 }
 0x11e   : > { %4751 = vmatprep.mubr.msk.bf16.mxu1 %vm479_vm2, %v1399_v17  ;;  %v1813_v17 = vrot.slane %v1811_v33, 2 }
 0x11f   : > { %v1828_v4 = vrot.slane %v1826_v13, 1 }
 0x120   : > { %4916 = vmatmul.mubr.msk.bf16.gmra.mrb[32].mxu0 %vm479_vm2, %v3060_v31  ;;  %v3354_v31 = vsel %vm3337_vm7, %v3351_v44, %v3353_v63  ;;  %v1814_v56 = vor.u32 %v1813_v17, %v1810_v9  ;;  %v3365_v44 = vrot.slane %v6028_v36, 3  ;;  %v3369_v36 = vrot.slane %v6046_v62, 3 }
 0x121   : > { %4921 = vmatprep.mubr.msk.bf16.mxu0 %vm479_vm2, %v3340_v58  ;;  %v3356_v58 = vsel %vm3337_vm7, %v3353_v63, %v3355_v48  ;;  %v1832_v50 = vor.u32 %v1831_v11, %v1828_v4  ;;  %v6349_v11 = vld [vmem:[%s6512_s3] ss:$0 sm:$0xff] }
 0x122   : > { %v1815_v7 = vsel %vm1690_vm3, %v1805_v60, %v1814_v56  ;;  %v3370_v43 = vsel %vm3337_vm7, %v3367_v40, %v3369_v36  ;;  %v3372_v33 = vsel %vm3337_vm7, %v3369_v36, %v3371_v3 }
 0x125   : > { %4752 = vmatmul.mubr.msk.bf16.gmra.mrb[20].mxu1 %vm479_vm2, %v1401_v34  ;;  %v1819_v34 = vrot.slane %v1817_v24, 1 }
 0x126   : > { %4755 = vmatprep.mubr.msk.bf16.mxu1 %vm479_vm2, %v1403_v49  ;;  %v3357_v49 = vrot.slane %v5986_v47, 3  ;;  %v1844_v47 = vshrl.u32 %v5873_v26, 16 }
 0x127   : > { %v1823_v12 = vor.u32 %v1822_v38, %v1819_v34 }
 0x128   : > { %4922 = vmatmul.mubr.msk.bf16.vlgmr.msra.gmra.mrb[0].mxu0 %vm479_vm2, %v3342_v6  ;;  %v3359_v6 = vrot.slane %v5991_v52, 3  ;;  %v1846_v23 = vrot.slane %v1844_v47, 1 }
 0x129   : > { %4925 = vmatprep.mubr.msk.bf16.mxu0 %vm479_vm2, %v3344_v42  ;;  %v1838_v42 = vshll.u32 %v5869_v22, 16  ;;  %v1824_v52 = vsel %vm1690_vm3, %v1814_v56, %v1823_v12  ;;  %v1833_v22 = vsel %vm1690_vm3, %v1823_v12, %v1832_v50 }
 0x12a   : > { %v3360_v18 = vsel %vm3337_vm7, %v3357_v49, %v3359_v6  ;;  %v3362_v2 = vsel %vm3337_vm7, %v3359_v6, %v3361_v45 }
 0x12d   : > { %4756 = vmatmul.mubr.msk.bf16.gmra.mrb[24].mxu1 %vm479_vm2, %v1405_v46  ;;  %v3358_v46 = vsel %vm3337_vm7, %v3355_v48, %v3357_v49  ;;  %v6344_v49 = vld [vmem:[%s6511_s2] ss:$0 sm:$0xff] }
 0x12e   : > { %4759 = vmatprep.mubr.msk.bf16.mxu1 %vm479_vm2, %v1407_v37  ;;  %v1847_v37 = vshll.u32 %v5873_v26, 16 }
 0x130   : > { %4926 = vmatmul.mubr.msk.bf16.gmra.mrb[4].mxu0 %vm479_vm2, %v3346_v25  ;;  %v1840_v25 = vrot.slane %v1838_v42, 2  ;;  %v1849_v35 = vrot.slane %v1847_v37, 2 }
 0x131   : > { %4929 = vmatprep.mubr.msk.bf16.mxu0 %vm479_vm2, %v3348_v53  ;;  %v3363_v53 = vrot.slane %v6015_v21, 3  ;;  %v1858_v21 = vrot.slane %v1856_v41, 2 }
 0x132   : > { %v1841_v26 = vor.u32 %v1840_v25, %v1837_v10 }
 0x133   : > { %v3364_v5 = vsel %vm3337_vm7, %v3361_v45, %v3363_v53  ;;  %v3366_v39 = vsel %vm3337_vm7, %v3363_v53, %v3365_v44 }
 0x134   : > { %v1842_v32 = vsel %vm1690_vm3, %v1832_v50, %v1841_v26 }
 0x135   : > { %4760 = vmatmul.mubr.msk.bf16.gmra.mrb[28].mxu1 %vm479_vm2, %v1409_v28  ;;  %v1853_v28 = vshrl.u32 %v5889_v59, 16 }
 0x136   : > { %4763 = vmatprep.mubr.msk.bf16.mxu1 %vm479_vm2, %v1411_v27  ;;  %v1850_v27 = vor.u32 %v1849_v35, %v1846_v23 }
 0x137   : > { %v1855_v20 = vrot.slane %v1853_v28, 1 }
 0x138   : > { %4930 = vmatmul.mubr.msk.bf16.gmra.mrb[8].mxu0 %vm479_vm2, %v3350_v29  ;;  %v1851_v55 = vsel %vm1690_vm3, %v1841_v26, %v1850_v27  ;;  %v3368_v29 = vsel %vm3337_vm7, %v3365_v44, %v3367_v40 }
 0x139   : > { %4933 = vmatprep.mubr.msk.bf16.mxu0 %vm479_vm2, %v3352_v61  ;;  %v1859_v59 = vor.u32 %v1858_v21, %v1855_v20  ;;  %v3373_v61 = vrot.slane %v6186_v0, 3 }
 0x13b   : > { %v1860_v19 = vsel %vm1690_vm3, %v1850_v27, %v1859_v59 }
 0x13d   : > { %4764 = vmatmul.mubr.msk.bf16.gmra.mrb[32].mxu1 %vm479_vm2, %v1413_v1  ;;  %v3374_v1 = vsel %vm3337_vm7, %v3371_v3, %v3373_v61 }
 0x13e   : > { %4789 = vmatprep.mubr.msk.bf16.mxu1 %vm479_vm2, %v1797_v57 }
 0x140   : > { %4934 = vmatmul.mubr.msk.bf16.gmra.mrb[12].mxu0 %vm479_vm2, %v3354_v31 }
 0x141   : > { %4937 = vmatprep.mubr.msk.bf16.mxu0 %vm479_vm2, %v3356_v58 }
 0x145   : > { %4790 = vmatmul.mubr.msk.bf16.vlgmr.msra.gmra.mrb[20].mxu1 %vm479_vm2, %v1806_v8 }
 0x146   : > { %4793 = vmatprep.mubr.msk.bf16.mxu1 %vm479_vm2, %v1815_v7 }
 0x148   : > { %4938 = vmatmul.mubr.msk.bf16.gmra.mrb[16].mxu0 %vm479_vm2, %v3358_v46 }
 0x149   : > { %4941 = vmatprep.mubr.msk.bf16.mxu0 %vm479_vm2, %v3360_v18 }
 0x14d   : > { %4794 = vmatmul.mubr.msk.bf16.gmra.mrb[24].mxu1 %vm479_vm2, %v1824_v52 }
 0x14e   : > { %4797 = vmatprep.mubr.msk.bf16.mxu1 %vm479_vm2, %v1833_v22 }
 0x150   : > { %4942 = vmatmul.mubr.msk.bf16.gmra.mrb[20].mxu0 %vm479_vm2, %v3362_v2 }
 0x151   : > { %4945 = vmatprep.mubr.msk.bf16.mxu0 %vm479_vm2, %v3364_v5 }
 0x155   : > { %4798 = vmatmul.mubr.msk.bf16.gmra.mrb[28].mxu1 %vm479_vm2, %v1842_v32 }
 0x156   : > { %4801 = vmatprep.mubr.msk.bf16.mxu1 %vm479_vm2, %v1851_v55 }
 0x158   : > { %4946 = vmatmul.mubr.msk.bf16.gmra.mrb[24].mxu0 %vm479_vm2, %v3366_v39 }
 0x159   : > { %4949 = vmatprep.mubr.msk.bf16.mxu0 %vm479_vm2, %v3368_v29 }
 0x15d   : > { %4802 = vmatmul.mubr.msk.bf16.gmra.mrb[32].mxu1 %vm479_vm2, %v1860_v19 }
 0x160   : > { %4950 = vmatmul.mubr.msk.bf16.gmra.mrb[28].mxu0 %vm479_vm2, %v3370_v43 }
 0x161   : > { %4953 = vmatprep.mubr.msk.bf16.mxu0 %vm479_vm2, %v3372_v33 }
 0x168   : > { %4954 = vmatmul.mubr.msk.bf16.gmra.mrb[32].mxu0 %vm479_vm2, %v3374_v1 }
 0x1d0   : > { %v4733_v51 = vpop.f32.mrb[0].mxu1 }
 0x1d1   : > { %v1505_v62 = vpop.f32.mrb[1].mxu1 }
 0x1d2   : > { %v4734_v16 = vpop.f32.mrb[2].mxu1 }
 0x1d3   : > { %v1508_v14 = vpop.f32.mrb[3].mxu1 }
 0x1d8   : > { %v4737_v63 = vpop.f32.mrb[4].mxu1 }
 0x1d9   : > { %v1521_v57 = vpop.f32.mrb[5].mxu1 }
 0x1da   : > { %v4738_v9 = vpop.f32.mrb[6].mxu1 }
 0x1db   : > { %v1524_v17 = vpop.f32.mrb[7].mxu1 }
 0x1e0   : > { %v4741_v48 = vpop.f32.mrb[8].mxu1 }
 0x1e1   : > { %v6319_v60 = vpop.f32.mrb[9].mxu1 }
 0x1e2   : > { %v6321_v24 = vpop.f32.mrb[10].mxu1 }
 0x1e3   : > { %v6323_v54 = vpop.f32.mrb[11].mxu1 }
 0x1e8   : > { %v6325_v0 = vpop.f32.mrb[12].mxu1 }
 0x1e9   : > { %v6327_v31 = vpop.f32.mrb[13].mxu1 }
 0x1ea   : > { %v6329_v56 = vpop.f32.mrb[14].mxu1 }
 0x1eb   : > { %v6331_v13 = vpop.f32.mrb[15].mxu1 }
 0x1f0   : > { %v6333_v15 = vpop.f32.mrb[16].mxu1 }
 0x1f1   : > { %v6335_v58 = vpop.f32.mrb[17].mxu1 }
 0x1f2   : > { %v6337_v8 = vpop.f32.mrb[18].mxu1 }
 0x1f3   : > { %v6339_v34 = vpop.f32.mrb[19].mxu1 }
 0x1fb   : > { %v4923_v38 = vpop.f32.mrb[0].mxu0 }
 0x1fc   : > { %v4959_v7 = vadd.f32 %v4923_v38, %v4733_v51  ;;  %v3466_v4 = vpop.f32.mrb[1].mxu0 }
 0x1fd   : > { %v4960_v6 = vadd.f32 %v3466_v4, %v1505_v62  ;;  %v4924_v12 = vpop.f32.mrb[2].mxu0 }
 0x1fe   : > { %v3654_v30 = vmul.f32 %v4959_v7, %v6344_v49  ;;  %v4961_v42 = vadd.f32 %v4924_v12, %v4734_v16  ;;  %v3469_v46 = vpop.f32.mrb[3].mxu0 }
 0x1ff   : > { %v3652_v50 = vmul.f32 %v4960_v6, %v6344_v49  ;;  %v4962_v47 = vadd.f32 %v3469_v46, %v1508_v14 }
 0x200   : > { %v3697_v37 = vadd.f32 %v6349_v11, %v3654_v30  ;;  %v3655_v18 = vmul.f32 %v4961_v42, %v6344_v49 }
 0x201   : > { %v3695_v52 = vadd.f32 %v6349_v11, %v3652_v50  ;;  %v3653_v10 = vmul.f32 %v4962_v47, %v6344_v49 }
 0x202   : > { %v3698_v25 = vadd.f32 %v6349_v11, %v3655_v18  ;;  %v3733_v23 = vmax.f32 %v3697_v37, 0.0 }
 0x203   : > { %v3696_v45 = vadd.f32 %v6349_v11, %v3653_v10  ;;  %v4927_v22 = vpop.f32.mrb[4].mxu0  ;;  %v3731_v28 = vmax.f32 %v3695_v52, 0.0 }
 0x204   : > { %v3734_v35 = vmax.f32 %v3698_v25, 0.0  ;;  %v4963_v53 = vadd.f32 %v4927_v22, %v4737_v63  ;;  %v3482_v26 = vpop.f32.mrb[5].mxu0 }
 0x205   : > { %v3732_v41 = vmax.f32 %v3696_v45, 0.0  ;;  %v4964_v2 = vadd.f32 %v3482_v26, %v1521_v57  ;;  %v4928_v27 = vpop.f32.mrb[6].mxu0 }
 0x206   : > { %v4345_v5 = vpack.c.bf16 %v3734_v35, %v3733_v23  ;;  %v3658_v32 = vmul.f32 %v4963_v53, %v6344_v49  ;;  %v4965_v20 = vadd.f32 %v4928_v27, %v4738_v9  ;;  %v3485_v21 = vpop.f32.mrb[7].mxu0 }
 0x207   : > { %v4340_v44 = vpack.c.bf16 %v3732_v41, %v3731_v28  ;;  %v3656_v55 = vmul.f32 %v4964_v2, %v6344_v49  ;;  %v4966_v40 = vadd.f32 %v3485_v21, %v1524_v17 }
 0x208   : > { %4427 = vst [vmem:[%s6364_s20 + $0x8] sm:$0xff] %v4345_v5   ;;  %v3701_v59 = vadd.f32 %v6349_v11, %v3658_v32  ;;  %v3659_v39 = vmul.f32 %v4965_v20, %v6344_v49 }
 0x209   : > { %4341 = vst [vmem:[%s6364_s20] sm:$0xff] %v4340_v44   ;;  %v3699_v29 = vadd.f32 %v6349_v11, %v3656_v55  ;;  %v3657_v19 = vmul.f32 %v4966_v40, %v6344_v49 }
 0x20a   : > { %v3702_v36 = vadd.f32 %v6349_v11, %v3659_v39  ;;  %v3737_v33 = vmax.f32 %v3701_v59, 0.0 }
 0x20b   : > { %v3700_v3 = vadd.f32 %v6349_v11, %v3657_v19  ;;  %v4931_v43 = vpop.f32.mrb[8].mxu0  ;;  %v3735_v62 = vmax.f32 %v3699_v29, 0.0 }
 0x20c   : > { %v3738_v61 = vmax.f32 %v3702_v36, 0.0  ;;  %v4967_v1 = vadd.f32 %v4931_v43, %v4741_v48  ;;  %v3498_v51 = vpop.f32.mrb[9].mxu0 }
 0x20d   : > { %v3736_v16 = vmax.f32 %v3700_v3, 0.0  ;;  %v4968_v14 = vadd.f32 %v3498_v51, %v6319_v60  ;;  %v4932_v63 = vpop.f32.mrb[10].mxu0 }
 0x20e   : > { %v4355_v57 = vpack.c.bf16 %v3738_v61, %v3737_v33  ;;  %v3662_v9 = vmul.f32 %v4967_v1, %v6344_v49  ;;  %v4969_v17 = vadd.f32 %v4932_v63, %v6321_v24  ;;  %v3501_v38 = vpop.f32.mrb[11].mxu0 }
 0x20f   : > { %v4350_v7 = vpack.c.bf16 %v3736_v16, %v3735_v62  ;;  %v3660_v4 = vmul.f32 %v4968_v14, %v6344_v49  ;;  %v4970_v6 = vadd.f32 %v3501_v38, %v6323_v54 }
 0x210   : > { %4429 = vst [vmem:[%s6364_s20 + $0x18] sm:$0xff] %v4355_v57   ;;  %v3705_v48 = vadd.f32 %v6349_v11, %v3662_v9  ;;  %v3663_v12 = vmul.f32 %v4969_v17, %v6344_v49 }
 0x211   : > { %4428 = vst [vmem:[%s6364_s20 + $0x10] sm:$0xff] %v4350_v7   ;;  %v3703_v60 = vadd.f32 %v6349_v11, %v3660_v4  ;;  %v3661_v30 = vmul.f32 %v4970_v6, %v6344_v49 }
 0x212   : > { %v3706_v42 = vadd.f32 %v6349_v11, %v3663_v12  ;;  %v3741_v50 = vmax.f32 %v3705_v48, 0.0 }
 0x213   : > { %v3704_v24 = vadd.f32 %v6349_v11, %v3661_v30  ;;  %v4935_v46 = vpop.f32.mrb[12].mxu0  ;;  %v3739_v18 = vmax.f32 %v3703_v60, 0.0 }
 0x214   : > { %v3742_v47 = vmax.f32 %v3706_v42, 0.0  ;;  %v4971_v54 = vadd.f32 %v4935_v46, %v6325_v0  ;;  %v3514_v37 = vpop.f32.mrb[13].mxu0 }
 0x215   : > { %v3740_v52 = vmax.f32 %v3704_v24, 0.0  ;;  %v4972_v10 = vadd.f32 %v3514_v37, %v6327_v31  ;;  %v4936_v25 = vpop.f32.mrb[14].mxu0 }
 0x216   : > { %v4365_v45 = vpack.c.bf16 %v3742_v47, %v3741_v50  ;;  %v3666_v22 = vmul.f32 %v4971_v54, %v6344_v49  ;;  %v4973_v23 = vadd.f32 %v4936_v25, %v6329_v56  ;;  %v3517_v35 = vpop.f32.mrb[15].mxu0 }
 0x217   : > { %v4360_v26 = vpack.c.bf16 %v3740_v52, %v3739_v18  ;;  %v3664_v28 = vmul.f32 %v4972_v10, %v6344_v49  ;;  %v4974_v41 = vadd.f32 %v3517_v35, %v6331_v13 }
 0x218   : > { %v4791_v53 = vpop.f32.mrb[20].mxu1  ;;  %4431 = vst [vmem:[%s6364_s20 + $0x28] sm:$0xff] %v4365_v45   ;;  %v3709_v2 = vadd.f32 %v6349_v11, %v3666_v22  ;;  %v3667_v27 = vmul.f32 %v4973_v23, %v6344_v49 }
 0x219   : > { %v2032_v0 = vpop.f32.mrb[21].mxu1  ;;  %4430 = vst [vmem:[%s6364_s20 + $0x20] sm:$0xff] %v4360_v26   ;;  %v3707_v5 = vadd.f32 %v6349_v11, %v3664_v28  ;;  %v3665_v32 = vmul.f32 %v4974_v41, %v6344_v49 }
 0x21a   : > { %v4792_v31 = vpop.f32.mrb[22].mxu1  ;;  %v3710_v20 = vadd.f32 %v6349_v11, %v3667_v27  ;;  %v3745_v55 = vmax.f32 %v3709_v2, 0.0 }
 0x21b   : > { %v2035_v56 = vpop.f32.mrb[23].mxu1  ;;  %v3708_v21 = vadd.f32 %v6349_v11, %v3665_v32  ;;  %v4939_v44 = vpop.f32.mrb[16].mxu0  ;;  %v3743_v39 = vmax.f32 %v3707_v5, 0.0 }
 0x21c   : > { %v3746_v13 = vmax.f32 %v3710_v20, 0.0  ;;  %v4975_v40 = vadd.f32 %v4939_v44, %v6333_v15  ;;  %v3530_v59 = vpop.f32.mrb[17].mxu0 }
 0x21d   : > { %v3744_v29 = vmax.f32 %v3708_v21, 0.0  ;;  %v4976_v19 = vadd.f32 %v3530_v59, %v6335_v58  ;;  %v4940_v36 = vpop.f32.mrb[18].mxu0 }
 0x21e   : > { %v4375_v3 = vpack.c.bf16 %v3746_v13, %v3745_v55  ;;  %v3670_v43 = vmul.f32 %v4975_v40, %v6344_v49  ;;  %v4977_v33 = vadd.f32 %v4940_v36, %v6337_v8  ;;  %v3533_v61 = vpop.f32.mrb[19].mxu0 }
 0x21f   : > { %v4370_v51 = vpack.c.bf16 %v3744_v29, %v3743_v39  ;;  %v3668_v62 = vmul.f32 %v4976_v19, %v6344_v49  ;;  %v4978_v16 = vadd.f32 %v3533_v61, %v6339_v34 }
 0x220   : > { %v4795_v1 = vpop.f32.mrb[24].mxu1  ;;  %4433 = vst [vmem:[%s6364_s20 + $0x38] sm:$0xff] %v4375_v3   ;;  %v3713_v14 = vadd.f32 %v6349_v11, %v3670_v43  ;;  %v3671_v63 = vmul.f32 %v4977_v33, %v6344_v49 }
 0x221   : > { %v2048_v15 = vpop.f32.mrb[25].mxu1  ;;  %4432 = vst [vmem:[%s6364_s20 + $0x30] sm:$0xff] %v4370_v51   ;;  %v3711_v57 = vadd.f32 %v6349_v11, %v3668_v62  ;;  %v3669_v9 = vmul.f32 %v4978_v16, %v6344_v49 }
 0x222   : > { %v4796_v58 = vpop.f32.mrb[26].mxu1  ;;  %v3714_v17 = vadd.f32 %v6349_v11, %v3671_v63  ;;  %v3749_v4 = vmax.f32 %v3713_v14, 0.0 }
 0x223   : > { %v2051_v8 = vpop.f32.mrb[27].mxu1  ;;  %v3712_v38 = vadd.f32 %v6349_v11, %v3669_v9  ;;  %v4943_v7 = vpop.f32.mrb[20].mxu0  ;;  %v3747_v12 = vmax.f32 %v3711_v57, 0.0 }
 0x224   : > { %v3750_v34 = vmax.f32 %v3714_v17, 0.0  ;;  %v4979_v6 = vadd.f32 %v4943_v7, %v4791_v53  ;;  %v3546_v48 = vpop.f32.mrb[21].mxu0 }
 0x225   : > { %v3748_v60 = vmax.f32 %v3712_v38, 0.0  ;;  %v4980_v30 = vadd.f32 %v3546_v48, %v2032_v0  ;;  %v4944_v42 = vpop.f32.mrb[22].mxu0 }
 0x226   : > { %v4385_v24 = vpack.c.bf16 %v3750_v34, %v3749_v4  ;;  %v3674_v46 = vmul.f32 %v4979_v6, %v6344_v49  ;;  %v4981_v50 = vadd.f32 %v4944_v42, %v4792_v31  ;;  %v3549_v47 = vpop.f32.mrb[23].mxu0 }
 0x227   : > { %v4380_v37 = vpack.c.bf16 %v3748_v60, %v3747_v12  ;;  %v3672_v18 = vmul.f32 %v4980_v30, %v6344_v49  ;;  %v4982_v52 = vadd.f32 %v3549_v47, %v2035_v56 }
 0x228   : > { %v4799_v54 = vpop.f32.mrb[28].mxu1  ;;  %4435 = vst [vmem:[%s6364_s20 + $0x48] sm:$0xff] %v4385_v24   ;;  %v3717_v25 = vadd.f32 %v6349_v11, %v3674_v46  ;;  %v3675_v45 = vmul.f32 %v4981_v50, %v6344_v49 }
 0x229   : > { %v2064_v10 = vpop.f32.mrb[29].mxu1  ;;  %4434 = vst [vmem:[%s6364_s20 + $0x40] sm:$0xff] %v4380_v37   ;;  %v3715_v23 = vadd.f32 %v6349_v11, %v3672_v18  ;;  %v3673_v35 = vmul.f32 %v4982_v52, %v6344_v49 }
 0x22a   : > { %v4800_v22 = vpop.f32.mrb[30].mxu1  ;;  %v3718_v26 = vadd.f32 %v6349_v11, %v3675_v45  ;;  %v3753_v0 = vmax.f32 %v3717_v25, 0.0 }
 0x22b   : > { %v2067_v53 = vpop.f32.mrb[31].mxu1  ;;  %v3716_v28 = vadd.f32 %v6349_v11, %v3673_v35  ;;  %v4947_v41 = vpop.f32.mrb[24].mxu0  ;;  %v3751_v5 = vmax.f32 %v3715_v23, 0.0 }
 0x22c   : > { %v3754_v2 = vmax.f32 %v3718_v26, 0.0  ;;  %v4983_v27 = vadd.f32 %v4947_v41, %v4795_v1  ;;  %v3562_v31 = vpop.f32.mrb[25].mxu0 }
 0x22d   : > { %v3752_v32 = vmax.f32 %v3716_v28, 0.0  ;;  %v4984_v56 = vadd.f32 %v3562_v31, %v2048_v15  ;;  %v4948_v20 = vpop.f32.mrb[26].mxu0 }
 0x22e   : > { %v4395_v21 = vpack.c.bf16 %v3754_v2, %v3753_v0  ;;  %v3678_v44 = vmul.f32 %v4983_v27, %v6344_v49  ;;  %v4985_v55 = vadd.f32 %v4948_v20, %v4796_v58  ;;  %v3565_v13 = vpop.f32.mrb[27].mxu0 }
 0x22f   : > { %v4390_v59 = vpack.c.bf16 %v3752_v32, %v3751_v5  ;;  %v3676_v39 = vmul.f32 %v4984_v56, %v6344_v49  ;;  %v4986_v29 = vadd.f32 %v3565_v13, %v2051_v8 }
 0x230   : > { %v4803_v40 = vpop.f32.mrb[32].mxu1  ;;  %4437 = vst [vmem:[%s6364_s20 + $0x58] sm:$0xff] %v4395_v21   ;;  %v3721_v36 = vadd.f32 %v6349_v11, %v3678_v44  ;;  %v3679_v3 = vmul.f32 %v4985_v55, %v6344_v49 }
 0x231   : > { %v2080_v19 = vpop.f32.mrb[33].mxu1  ;;  %4436 = vst [vmem:[%s6364_s20 + $0x50] sm:$0xff] %v4390_v59   ;;  %v3719_v33 = vadd.f32 %v6349_v11, %v3676_v39  ;;  %v3677_v61 = vmul.f32 %v4986_v29, %v6344_v49 }
 0x232   : > { %v4804_v43 = vpop.f32.mrb[34].mxu1  ;;  %v3722_v51 = vadd.f32 %v6349_v11, %v3679_v3  ;;  %v3757_v15 = vmax.f32 %v3721_v36, 0.0 }
 0x233   : > { %v2083_v1 = vpop.f32.mrb[35].mxu1  ;;  %v3720_v62 = vadd.f32 %v6349_v11, %v3677_v61  ;;  %v4951_v16 = vpop.f32.mrb[28].mxu0  ;;  %v3755_v57 = vmax.f32 %v3719_v33, 0.0 }
 0x234   : > { %v3758_v14 = vmax.f32 %v3722_v51, 0.0  ;;  %v4987_v63 = vadd.f32 %v4951_v16, %v4799_v54  ;;  %v3578_v58 = vpop.f32.mrb[29].mxu0 }
 0x235   : > { %v3756_v9 = vmax.f32 %v3720_v62, 0.0  ;;  %v4988_v8 = vadd.f32 %v3578_v58, %v2064_v10  ;;  %v4952_v17 = vpop.f32.mrb[30].mxu0 }
 0x236   : > { %v4405_v38 = vpack.c.bf16 %v3758_v14, %v3757_v15  ;;  %v3682_v7 = vmul.f32 %v4987_v63, %v6344_v49  ;;  %v4989_v4 = vadd.f32 %v4952_v17, %v4800_v22  ;;  %v3581_v34 = vpop.f32.mrb[31].mxu0 }
 0x237   : > { %v4400_v6 = vpack.c.bf16 %v3756_v9, %v3755_v57  ;;  %v3680_v48 = vmul.f32 %v4988_v8, %v6344_v49  ;;  %v4990_v12 = vadd.f32 %v3581_v34, %v2067_v53 }
 0x238   : > { %4439 = vst [vmem:[%s6364_s20 + $0x68] sm:$0xff] %v4405_v38   ;;  %v3725_v60 = vadd.f32 %v6349_v11, %v3682_v7  ;;  %v3683_v30 = vmul.f32 %v4989_v4, %v6344_v49 }
 0x239   : > { %4438 = vst [vmem:[%s6364_s20 + $0x60] sm:$0xff] %v4400_v6   ;;  %v3723_v42 = vadd.f32 %v6349_v11, %v3680_v48  ;;  %v3681_v24 = vmul.f32 %v4990_v12, %v6344_v49 }
 0x23a   : > { %v3726_v46 = vadd.f32 %v6349_v11, %v3683_v30  ;;  %v3761_v54 = vmax.f32 %v3725_v60, 0.0 }
 0x23b   : > { %v3724_v50 = vadd.f32 %v6349_v11, %v3681_v24  ;;  %v4955_v47 = vpop.f32.mrb[32].mxu0  ;;  %v3759_v10 = vmax.f32 %v3723_v42, 0.0 }
 0x23c   : > { %v3762_v37 = vmax.f32 %v3726_v46, 0.0  ;;  %v4991_v18 = vadd.f32 %v4955_v47, %v4803_v40  ;;  %v3594_v52 = vpop.f32.mrb[33].mxu0 }
 0x23d   : > { %v3760_v25 = vmax.f32 %v3724_v50, 0.0  ;;  %v4992_v45 = vadd.f32 %v3594_v52, %v2080_v19  ;;  %v4956_v22 = vpop.f32.mrb[34].mxu0 }
 0x23e   : > { %v4415_v23 = vpack.c.bf16 %v3762_v37, %v3761_v54  ;;  %v3686_v35 = vmul.f32 %v4991_v18, %v6344_v49  ;;  %v4993_v53 = vadd.f32 %v4956_v22, %v4804_v43  ;;  %v3597_v26 = vpop.f32.mrb[35].mxu0 }
 0x23f   : > { %v4410_v28 = vpack.c.bf16 %v3760_v25, %v3759_v10  ;;  %v3684_v41 = vmul.f32 %v4992_v45, %v6344_v49  ;;  %v4994_v0 = vadd.f32 %v3597_v26, %v2083_v1 }
 0x240   : > { %4441 = vst [vmem:[%s6364_s20 + $0x78] sm:$0xff] %v4415_v23   ;;  %v3729_v2 = vadd.f32 %v6349_v11, %v3686_v35  ;;  %v3687_v27 = vmul.f32 %v4993_v53, %v6344_v49 }
 0x241   : > { %4440 = vst [vmem:[%s6364_s20 + $0x70] sm:$0xff] %v4410_v28   ;;  %v3727_v31 = vadd.f32 %v6349_v11, %v3684_v41  ;;  %v3685_v5 = vmul.f32 %v4994_v0, %v6344_v49 }
 0x242   : > { %v3730_v32 = vadd.f32 %v6349_v11, %v3687_v27  ;;  %v3765_v20 = vmax.f32 %v3729_v2, 0.0 }
 0x243   : > { %v3728_v56 = vadd.f32 %v6349_v11, %v3685_v5  ;;  %v3763_v44 = vmax.f32 %v3727_v31, 0.0 }
 0x244   : > { %v3766_v21 = vmax.f32 %v3730_v32, 0.0 }
 0x245   : > { %v3764_v55 = vmax.f32 %v3728_v56, 0.0 }
 0x246   : > { %v4425_v13 = vpack.c.bf16 %v3766_v21, %v3765_v20 }
 0x247   : > { %v4420_v49 = vpack.c.bf16 %v3764_v55, %v3763_v44 }
 0x248   : > { %4443 = vst [vmem:[%s6364_s20 + $0x88] sm:$0xff] %v4425_v13  }
 0x249   : > { %4442 = vst [vmem:[%s6364_s20 + $0x80] sm:$0xff] %v4420_v49  }
 0x24a   : > { %5387 = shalt.err (!%p5384_p3)
}
 0x24b   : > { %s5388_s8 = scalar_lea.hbm %s6460_s29, 2304  ;;  %s5392_s11 = scalar_lea.hbm %s6513_s4, 4608 }
 0x24c   : > { %p5389_p4 = scmp.ne.s32.totalorder %s6460_s29, %s5388_s8  ;;  %p5393_p9 = scmp.lt.u32.totalorder %s6460_s29, %s6513_s4 }
 0x24d   : > { %p5394_p10 = scmp.lt.u32.totalorder %s5392_s11, %s5388_s8  ;;  %p5396_p12 = scmp.lt.u32.totalorder %s5388_s8, %s6460_s29 }
 0x24e   : > { %p5390_p7 = pnand %p5389_p4, %p5504_p5 }
 0x24f   : > { %p5395_p11 = por %p5394_p10, %p5393_p9 }
 0x250   : > { %p5391_p8 = pneg %p5390_p7 }
 0x251   : > { %p5397_p13 = por %p5396_p12, %p5395_p11 }
 0x253   : > { %p5398_p0 = pnand %p5397_p13, %p5391_p8 }
 0x255   : > { %5401 = shalt.err (!%p5398_p0)
}
 0x256   : > { %s5439_s14 = smov 64   ;;  %s5440_s20 = smov 4  }
 0x257   : > { %5260 = dma.vmem_to_hbm [thread:$0]  (%p5504_p5), %s6462_s23, 2304, %s6460_s29, %s6468_s19, %s5439_s14, %s5439_s14, %s5440_s20  }
 0x258 PF: > { %p5266_p1 = scmp.ge.s32.totalorder %s5436_s18, 2  ;;  %s3976_s22 = sand.u32 1, %s5424_s15  }
 0x259   : > { %s3977_s27 = scalar_lea.sflag [#allocation3], %s3976_s22 }
 0x25a   : > { %p5263_p2 = pnand %p5266_p1, %p5508_p6 }
 0x25c   : > { %5419 = dma.done.wait (!%p5263_p2), %s3977_s27, 2304  }
 0x25d   : > { %5421 = vsyncadd (!%p5263_p2), %s3977_s27, 4294964992  ;;  %p14_p3 = scmp.ge.s32.totalorder %s5491_s21, 4   ;;  %s6516_s15 = smov %s5428_s16 }
 0x25e   : > { %s6517_s16 = smov %s5432_s17  ;;  %s6518_s17 = smov %s5502_s24 }
 0x25f   : > { %s6519_s18 = smov %s5491_s21  ;;  %16 = sbr.rel (!%p14_p3) target bundleno = 3 (0x3), region = 79 }
 0x266   :  { %3982 = vsyncpa [#allocation3], 1 }
 0x267   :  { %3984 = vsyncpa [#allocation3 + $0x1], 1 }

</bundles_post_ra>
